<compile_context>
chip_gen: v7x
topology: tpu7x:2x2x1
jax: 0.10.0
libtpu: 0.0.40
codegen_flags: <defaults>
</compile_context>

<pallas_src>
import functools

import jax
import jax.numpy as jnp
from jax.experimental import pallas as pl
from jax.experimental.pallas import tpu as pltpu


def _contextual_kernel(mu_ref, x_ref, y_ref, c_ref, cx_ref,
                       yn_ref, max_ref, dsel_ref, *, inv_h, row_tile):
    t = pl.program_id(1)
    n_tiles = pl.num_programs(1)
    mu = mu_ref[...]                                        # (C, 1)

    # Once per batch element: channel-normalize y into VMEM scratch, reset accumulators.
    @pl.when(t == 0)
    def _():
        yc = y_ref[...] - mu                                # (C, HW)
        y_inv = jax.lax.rsqrt(
            jnp.maximum(jnp.sum(yc * yc, axis=0, keepdims=True), 1e-24))
        yn_ref[...] = yc * y_inv
        max_ref[...] = jnp.full_like(max_ref, -jnp.inf)
        dsel_ref[...] = jnp.zeros_like(dsel_ref)

    # Normalize this row tile of x (F.normalize(p=2, dim=channel) semantics).
    xc = x_ref[...] - mu                                    # (C, Ti)
    x_inv = jax.lax.rsqrt(
        jnp.maximum(jnp.sum(xc * xc, axis=0, keepdims=True), 1e-24))
    xn = xc * x_inv                                         # (C, Ti)
    yn = yn_ref[...]                                        # (C, HW)

    # Cosine similarity slab: s[i, j] = sum_c xn[c, i] * yn[c, j]  -> (Ti, HW) on MXU.
    s = jax.lax.dot_general(
        xn, yn, dimension_numbers=(((0,), (0,)), ((), ())),
        preferred_element_type=jnp.float32)
    dist_raw = jnp.maximum(1.0 - s, 0.0)                    # clamp(1 - sim, 0)

    # Relative distance + CX weights. Fold 1/h into the per-row scale so the (Ti, HW)
    # slab only needs one mul + one sub before the exp.
    row_scale = inv_h / (jnp.min(dist_raw, axis=1, keepdims=True) + 1e-5)   # (Ti, 1)
    w = jnp.exp(inv_h - dist_raw * row_scale)                                # (Ti, HW)
    inv_sum = 1.0 / (jnp.sum(w, axis=1, keepdims=True) + 1e-5)               # (Ti, 1)
    cxm = w * inv_sum                                                        # (Ti, HW)

    # Tile-local column max, first-argmax row, and dist_raw gathered at that row.
    tile_max = jnp.max(cxm, axis=0, keepdims=True)          # (1, HW)
    rows = jax.lax.broadcasted_iota(jnp.int32, cxm.shape, 0)
    first = jnp.min(jnp.where(cxm == tile_max, rows, row_tile),
                    axis=0, keepdims=True)                  # first argmax in tile
    d_at = jnp.sum(jnp.where(rows == first, dist_raw, 0.0),
                   axis=0, keepdims=True)                   # (1, HW)

    # Streaming merge. Strict '>' keeps the earliest maximum across tiles (row tiles
    # run in increasing row order), matching torch.max first-index tie-breaking.
    take_new = tile_max > max_ref[...]
    max_ref[...] = jnp.where(take_new, tile_max, max_ref[...])
    dsel_ref[...] = jnp.where(take_new, d_at, dsel_ref[...])

    @pl.when(t == n_tiles - 1)
    def _():
        # gather of exp((1-dist_raw)/h) at argmax -> only HW transcendentals.
        c = jnp.exp((1.0 - dsel_ref[...]) * inv_h)          # (1, HW)
        num = jnp.sum(max_ref[...] * c)
        den = jnp.sum(c)
        c_ref[...] = c
        cx_ref[...] = jnp.reshape(num / den, (1, 1))


def _pick_row_tile(hw, requested=None, slab_budget_bytes=28 << 20):
    """Largest multiple of 128 dividing hw, under a VMEM slab budget."""
    if hw % 128 != 0:
        return hw                       # block must equal the full dim if not lane aligned
    cap = hw if requested is None else max(128, min(requested, hw))
    fit = max(128, (slab_budget_bytes // (8 * 4 * hw)) // 128 * 128)
    cap = min(cap, fit)
    best = 128
    cand = 128
    while cand <= cap:
        if hw % cand == 0:
            best = cand
        cand += 128
    return best


def contextual_loss_pallas(x, y, band_width=0.5, row_tile=None):
    """x, y: (N, C, H, W) float32.  Returns (cx_loss scalar, c of shape (N, 1, H, W))."""
    N, C, H, W = x.shape
    HW = H * W

    # Channels-first flattened spatial: no transpose, lane-dense last dim.
    xf = x.reshape(N, C, HW).astype(jnp.float32)
    yf = y.reshape(N, C, HW).astype(jnp.float32)
    # y_mu = y.mean over (batch, spatial) per channel (global -> computed outside).
    y_mu = jnp.mean(yf, axis=(0, 2)).reshape(C, 1).astype(jnp.float32)

    ti = _pick_row_tile(HW, row_tile)
    assert HW % ti == 0
    n_tiles = HW // ti

    kernel = functools.partial(_contextual_kernel,
                               inv_h=float(1.0 / band_width), row_tile=ti)

    # VMEM budget: live slabs + double-buffered operands + scratch, capped per chip.
    est_bytes = 4 * (8 * ti * HW + 3 * C * HW + 2 * C * ti + 8 * HW + 2 * C)
    try:
        phys_vmem = int(pltpu.get_tpu_info().vmem_capacity_bytes)
    except Exception:
        phys_vmem = 64 << 20            # conservative (v7x per-core size)
    vmem_limit = int(min(max(est_bytes + (4 << 20), 16 << 20), phys_vmem * 3 // 4))

    cost = pl.CostEstimate(
        flops=int(2 * N * C * HW * HW + 8 * N * HW * HW),
        transcendentals=int(N * HW * HW + 2 * N * HW),
        bytes_accessed=int(4 * (2 * N * C * HW + N * (HW + 1) + C)),
    )

    c_out, cx_out = pl.pallas_call(
        kernel,
        out_shape=(
            jax.ShapeDtypeStruct((N, 1, HW), jnp.float32),
            jax.ShapeDtypeStruct((N, 1, 1), jnp.float32),
        ),
        grid_spec=pltpu.PrefetchScalarGridSpec(
            num_scalar_prefetch=0,
            grid=(N, n_tiles),
            in_specs=[
                pl.BlockSpec((C, 1), lambda n, t: (0, 0)),             # y_mu
                pl.BlockSpec((None, C, ti), lambda n, t: (n, 0, t)),   # x row tile
                pl.BlockSpec((None, C, HW), lambda n, t: (n, 0, 0)),   # full y (no re-fetch over t)
            ],
            out_specs=(
                pl.BlockSpec((None, 1, HW), lambda n, t: (n, 0, 0)),   # c (lane-dense)
                pl.BlockSpec((None, 1, 1), lambda n, t: (n, 0, 0)),    # per-batch cx
            ),
            scratch_shapes=[
                pltpu.VMEM((C, HW), jnp.float32),   # normalized y
                pltpu.VMEM((1, HW), jnp.float32),   # running column max of cx
                pltpu.VMEM((1, HW), jnp.float32),   # dist_raw at running argmax
            ],
        ),
        compiler_params=pltpu.CompilerParams(
            dimension_semantics=("parallel", "arbitrary"),
            vmem_limit_bytes=vmem_limit,
        ),
        cost_estimate=cost,
    )(y_mu, xf, yf)

    cx = cx_out.reshape(N)
    cx_loss = jnp.mean(-jnp.log(cx + 1e-5))
    c = c_out.reshape(N, 1, H, W)
    return cx_loss, c


def _reference_contextual_loss(x, y, band_width):
    """Pure-JAX mirror of the PyTorch reference (cosine path), for self-checking."""
    N, C, H, W = x.shape
    y_mu = jnp.mean(y, axis=(0, 2, 3), keepdims=True)
    xc = x - y_mu
    yc = y - y_mu
    xn = xc / jnp.maximum(jnp.sqrt(jnp.sum(xc * xc, axis=1, keepdims=True)), 1e-12)
    yn = yc / jnp.maximum(jnp.sqrt(jnp.sum(yc * yc, axis=1, keepdims=True)), 1e-12)
    xn = xn.reshape(N, C, -1)
    yn = yn.reshape(N, C, -1)
    dist_raw = jnp.clip(1.0 - jnp.einsum('nci,ncj->nij', xn, yn), 0.0, None)
    dist_min = jnp.min(dist_raw, axis=2, keepdims=True)
    dist_tilde = dist_raw / (dist_min + 1e-5)
    w = jnp.exp((1.0 - dist_tilde) / band_width)
    cx = w / (jnp.sum(w, axis=2, keepdims=True) + 1e-5)
    r_max = jnp.max(cx, axis=1)                             # (N, HW)
    r_idx = jnp.argmax(cx, axis=1)                          # (N, HW)
    gathered = jnp.take_along_axis(jnp.exp((1.0 - dist_raw) / band_width),
                                   r_idx[:, None, :], axis=1)[:, 0]   # (N, HW)
    cx_val = jnp.sum(r_max * gathered, axis=1) / jnp.sum(gathered, axis=1)
    return jnp.mean(-jnp.log(cx_val + 1e-5))


class ContextualLoss:
    """JAX/Pallas port of the PyTorch ContextualLoss (cosine, no VGG, no CoBi)."""

    def __init__(self, vgg=None, band_width=0.5, loss_type='cosine',
                 is_CoBi=False, use_vgg=False, vgg_layer='relu3_4'):
        assert loss_type == 'cosine', "only the 'cosine' loss_type is implemented"
        assert not is_CoBi, "CoBi variant not implemented in this kernel"
        self.band_width = band_width
        self.loss_type = loss_type
        self.is_CoBi = is_CoBi
        self.use_vgg = use_vgg
        # Deterministic buffers from __init__ (only used on the VGG path).
        self.vgg_mean = jnp.array([0.485, 0.456, 0.406],
                                  dtype=jnp.float32).reshape(1, 3, 1, 1)
        self.vgg_std = jnp.array([0.229, 0.224, 0.225],
                                 dtype=jnp.float32).reshape(1, 3, 1, 1)

    def __call__(self, x, y, row_tile=None):
        if self.use_vgg:
            # TODO(synk): external pretrained VGG feature extractor not reproduced.
            x = (x - self.vgg_mean) / self.vgg_std
            y = (y - self.vgg_mean) / self.vgg_std
        return contextual_loss_pallas(x, y, band_width=self.band_width,
                                      row_tile=row_tile)


if __name__ == "__main__":
    key = jax.random.PRNGKey(0)
    kx, ky = jax.random.split(key)
    N, C, H, W = 2, 8, 16, 16
    x = jax.random.normal(kx, (N, C, H, W), dtype=jnp.float32)
    y = jax.random.normal(ky, (N, C, H, W), dtype=jnp.float32)

    criterion = ContextualLoss(vgg=None, band_width=0.5,
                               loss_type='cosine', is_CoBi=False, use_vgg=False)
    # row_tile=128 with HW=256 exercises the streaming row-tiled accumulator path.
    cx_loss, c = criterion(x, y, row_tile=128)
    jax.block_until_ready(cx_loss)
    jax.block_until_ready(c)
    assert c.shape == (N, 1, H, W)
    assert cx_loss.shape == ()
    assert bool(jnp.isfinite(cx_loss))

    # Loose self-check of the scalar loss against a pure-JAX reference (loose tolerance
    # to stay robust to MXU precision / argmax near-tie differences).
    ref_loss = jax.block_until_ready(_reference_contextual_loss(x, y, 0.5))
    assert abs(float(cx_loss) - float(ref_loss)) <= 0.05 * abs(float(ref_loss)) + 1e-3, \
        (float(cx_loss), float(ref_loss))

    print("KERNEL_OK")
</pallas_src>

<mosaic_0001>
module attributes {stable_mosaic.version = 11 : i64} {
  func.func @_contextual_kernel(%arg0: i32, %arg1: i32, %arg2: memref<8x1xf32, #tpu.memory_space<vmem>>, %arg3: memref<1x8x128xf32, #tpu.memory_space<vmem>>, %arg4: memref<1x8x256xf32, #tpu.memory_space<vmem>>, %arg5: memref<1x1x256xf32, #tpu.memory_space<vmem>>, %arg6: memref<1x1x1xf32, #tpu.memory_space<vmem>>, %arg7: memref<8x256xf32, #tpu.memory_space<vmem>>, %arg8: memref<1x256xf32, #tpu.memory_space<vmem>>, %arg9: memref<1x256xf32, #tpu.memory_space<vmem>>) attributes {dimension_semantics = [#tpu.dimension_semantics<parallel>, #tpu.dimension_semantics<arbitrary>], iteration_bounds = array<i64: 2, 2>, scalar_prefetch = 0 : i64, scratch_operands = 3 : i64, tpu.core_type = #tpu.core_type<tc>, window_params = [{pipeline_mode = #tpu.pipeline_mode<synchronous>, transform_indices = @transform_0, window_bounds = array<i64: 8, 1>}, {transform_indices = @transform_1, window_bounds = array<i64: 1, 8, 128>}, {transform_indices = @transform_2, window_bounds = array<i64: 1, 8, 256>}, {transform_indices = @transform_3, window_bounds = array<i64: 1, 1, 256>}, {transform_indices = @transform_4, window_bounds = array<i64: 1, 1, 1>}]} {
    %c0 = arith.constant 0 : index
    %c0_0 = arith.constant 0 : index
    %0 = vector.load %arg2[%c0, %c0_0] : memref<8x1xf32, #tpu.memory_space<vmem>>, vector<8x1xf32>
    %c0_i32 = arith.constant 0 : i32
    %1 = arith.cmpi eq, %arg1, %c0_i32 : i32
    %2 = arith.extui %1 : i1 to i32
    %c0_i32_1 = arith.constant 0 : i32
    %3 = arith.cmpi ne, %2, %c0_i32_1 : i32
    scf.if %3 {
      %c0_33 = arith.constant 0 : index
      %c0_34 = arith.constant 0 : index
      %c0_35 = arith.constant 0 : index
      %67 = vector.load %arg4[%c0_33, %c0_34, %c0_35] : memref<1x8x256xf32, #tpu.memory_space<vmem>>, vector<1x8x256xf32>
      %68 = vector.shape_cast %67 : vector<1x8x256xf32> to vector<8x256xf32>
      %69 = vector.broadcast %0 : vector<8x1xf32> to vector<8x256xf32>
      %70 = arith.subf %68, %69 : vector<8x256xf32>
      %71 = arith.mulf %70, %70 : vector<8x256xf32>
      %cst_36 = arith.constant dense<0.000000e+00> : vector<256xf32>
      %72 = vector.multi_reduction <add>, %71, %cst_36 [0] : vector<8x256xf32> to vector<256xf32>
      %73 = vector.shape_cast %72 : vector<256xf32> to vector<1x256xf32>
      %cst_37 = arith.constant 1.000000e-24 : f32
      %74 = vector.broadcast %cst_37 : f32 to vector<1x256xf32>
      %75 = arith.maximumf %73, %74 : vector<1x256xf32>
      %76 = math.rsqrt %75 : vector<1x256xf32>
      %77 = vector.broadcast %76 : vector<1x256xf32> to vector<8x256xf32>
      %78 = arith.mulf %70, %77 : vector<8x256xf32>
      %c0_38 = arith.constant 0 : index
      %c0_39 = arith.constant 0 : index
      %79 = vector.load %arg7[%c0_38, %c0_39] : memref<8x256xf32, #tpu.memory_space<vmem>>, vector<8x256xf32>
      tpu.vector_store %arg7[%c0_38, %c0_39], %78 {strides = array<i32>} : memref<8x256xf32, #tpu.memory_space<vmem>>, vector<8x256xf32>,
      %cst_40 = arith.constant 0xFF800000 : f32
      %80 = vector.broadcast %cst_40 : f32 to vector<1x256xf32>
      %c0_41 = arith.constant 0 : index
      %c0_42 = arith.constant 0 : index
      %81 = vector.load %arg8[%c0_41, %c0_42] : memref<1x256xf32, #tpu.memory_space<vmem>>, vector<1x256xf32>
      tpu.vector_store %arg8[%c0_41, %c0_42], %80 {strides = array<i32>} : memref<1x256xf32, #tpu.memory_space<vmem>>, vector<1x256xf32>,
      %cst_43 = arith.constant 0.000000e+00 : f32
      %82 = vector.broadcast %cst_43 : f32 to vector<1x256xf32>
      %c0_44 = arith.constant 0 : index
      %c0_45 = arith.constant 0 : index
      %83 = vector.load %arg9[%c0_44, %c0_45] : memref<1x256xf32, #tpu.memory_space<vmem>>, vector<1x256xf32>
      tpu.vector_store %arg9[%c0_44, %c0_45], %82 {strides = array<i32>} : memref<1x256xf32, #tpu.memory_space<vmem>>, vector<1x256xf32>,
    } else {
    }
    %c0_2 = arith.constant 0 : index
    %c0_3 = arith.constant 0 : index
    %c0_4 = arith.constant 0 : index
    %4 = vector.load %arg3[%c0_2, %c0_3, %c0_4] : memref<1x8x128xf32, #tpu.memory_space<vmem>>, vector<1x8x128xf32>
    %5 = vector.shape_cast %4 : vector<1x8x128xf32> to vector<8x128xf32>
    %6 = vector.broadcast %0 : vector<8x1xf32> to vector<8x128xf32>
    %7 = arith.subf %5, %6 : vector<8x128xf32>
    %8 = arith.mulf %7, %7 : vector<8x128xf32>
    %cst = arith.constant dense<0.000000e+00> : vector<128xf32>
    %9 = vector.multi_reduction <add>, %8, %cst [0] : vector<8x128xf32> to vector<128xf32>
    %10 = vector.shape_cast %9 : vector<128xf32> to vector<1x128xf32>
    %cst_5 = arith.constant 1.000000e-24 : f32
    %11 = vector.broadcast %cst_5 : f32 to vector<1x128xf32>
    %12 = arith.maximumf %10, %11 : vector<1x128xf32>
    %13 = math.rsqrt %12 : vector<1x128xf32>
    %14 = vector.broadcast %13 : vector<1x128xf32> to vector<8x128xf32>
    %15 = arith.mulf %7, %14 : vector<8x128xf32>
    %c0_6 = arith.constant 0 : index
    %c0_7 = arith.constant 0 : index
    %16 = vector.load %arg7[%c0_6, %c0_7] : memref<8x256xf32, #tpu.memory_space<vmem>>, vector<8x256xf32>
    %cst_8 = arith.constant dense<0.000000e+00> : vector<128x256xf32>
    %17 = tpu.matmul %15, %16, %cst_8 {dimension_numbers = #tpu.dot_dimension_numbers<[0], [0], [1], [1], [0, 1, 1, 1], [], []>} : vector<8x128xf32>, vector<8x256xf32>, vector<128x256xf32> -> vector<128x256xf32>
    %cst_9 = arith.constant 1.000000e+00 : f32
    %18 = vector.broadcast %cst_9 : f32 to vector<128x256xf32>
    %19 = arith.subf %18, %17 : vector<128x256xf32>
    %cst_10 = arith.constant 0.000000e+00 : f32
    %20 = vector.broadcast %cst_10 : f32 to vector<128x256xf32>
    %21 = arith.maximumf %19, %20 : vector<128x256xf32>
    %cst_11 = arith.constant dense<0x7F800000> : vector<128xf32>
    %22 = vector.multi_reduction <minimumf>, %21, %cst_11 [1] : vector<128x256xf32> to vector<128xf32>
    %23 = vector.shape_cast %22 : vector<128xf32> to vector<128x1xf32>
    %cst_12 = arith.constant 9.99999974E-6 : f32
    %24 = vector.broadcast %cst_12 : f32 to vector<128x1xf32>
    %25 = arith.addf %23, %24 : vector<128x1xf32>
    %cst_13 = arith.constant 2.000000e+00 : f32
    %26 = vector.broadcast %cst_13 : f32 to vector<128x1xf32>
    %27 = arith.divf %26, %25 : vector<128x1xf32>
    %28 = vector.broadcast %27 : vector<128x1xf32> to vector<128x256xf32>
    %29 = arith.mulf %21, %28 : vector<128x256xf32>
    %cst_14 = arith.constant 2.000000e+00 : f32
    %30 = vector.broadcast %cst_14 : f32 to vector<128x256xf32>
    %31 = arith.subf %30, %29 : vector<128x256xf32>
    %32 = math.exp %31 : vector<128x256xf32>
    %cst_15 = arith.constant dense<0.000000e+00> : vector<128xf32>
    %33 = vector.multi_reduction <add>, %32, %cst_15 [1] : vector<128x256xf32> to vector<128xf32>
    %34 = vector.shape_cast %33 : vector<128xf32> to vector<128x1xf32>
    %cst_16 = arith.constant 9.99999974E-6 : f32
    %35 = vector.broadcast %cst_16 : f32 to vector<128x1xf32>
    %36 = arith.addf %34, %35 : vector<128x1xf32>
    %cst_17 = arith.constant 1.000000e+00 : f32
    %37 = vector.broadcast %cst_17 : f32 to vector<128x1xf32>
    %38 = arith.divf %37, %36 : vector<128x1xf32>
    %39 = vector.broadcast %38 : vector<128x1xf32> to vector<128x256xf32>
    %40 = arith.mulf %32, %39 : vector<128x256xf32>
    %cst_18 = arith.constant dense<0xFF800000> : vector<256xf32>
    %41 = vector.multi_reduction <maximumf>, %40, %cst_18 [0] : vector<128x256xf32> to vector<256xf32>
    %42 = vector.shape_cast %41 : vector<256xf32> to vector<1x256xf32>
    %43 = tpu.iota {dimensions = array<i32: 0>} : vector<128x256xi32>
    %44 = vector.broadcast %42 : vector<1x256xf32> to vector<128x256xf32>
    %45 = arith.cmpf oeq, %40, %44 : vector<128x256xf32>
    %c128_i32 = arith.constant 128 : i32
    %46 = vector.broadcast %c128_i32 : i32 to vector<128x256xi32>
    %47 = arith.select %45, %43, %46 : vector<128x256xi1>, vector<128x256xi32>
    %cst_19 = arith.constant dense<2147483647> : vector<256xi32>
    %48 = vector.multi_reduction <minsi>, %47, %cst_19 [0] : vector<128x256xi32> to vector<256xi32>
    %49 = vector.shape_cast %48 : vector<256xi32> to vector<1x256xi32>
    %50 = vector.broadcast %49 : vector<1x256xi32> to vector<128x256xi32>
    %51 = arith.cmpi eq, %43, %50 : vector<128x256xi32>
    %cst_20 = arith.constant 0.000000e+00 : f32
    %52 = vector.broadcast %cst_20 : f32 to vector<128x256xf32>
    %53 = arith.select %51, %21, %52 : vector<128x256xi1>, vector<128x256xf32>
    %cst_21 = arith.constant dense<0.000000e+00> : vector<256xf32>
    %54 = vector.multi_reduction <add>, %53, %cst_21 [0] : vector<128x256xf32> to vector<256xf32>
    %55 = vector.shape_cast %54 : vector<256xf32> to vector<1x256xf32>
    %c0_22 = arith.constant 0 : index
    %c0_23 = arith.constant 0 : index
    %56 = vector.load %arg8[%c0_22, %c0_23] : memref<1x256xf32, #tpu.memory_space<vmem>>, vector<1x256xf32>
    %57 = arith.cmpf ogt, %42, %56 : vector<1x256xf32>
    %c0_24 = arith.constant 0 : index
    %c0_25 = arith.constant 0 : index
    %58 = vector.load %arg8[%c0_24, %c0_25] : memref<1x256xf32, #tpu.memory_space<vmem>>, vector<1x256xf32>
    %59 = arith.select %57, %42, %58 : vector<1x256xi1>, vector<1x256xf32>
    %c0_26 = arith.constant 0 : index
    %c0_27 = arith.constant 0 : index
    %60 = vector.load %arg8[%c0_26, %c0_27] : memref<1x256xf32, #tpu.memory_space<vmem>>, vector<1x256xf32>
    tpu.vector_store %arg8[%c0_26, %c0_27], %59 {strides = array<i32>} : memref<1x256xf32, #tpu.memory_space<vmem>>, vector<1x256xf32>,
    %c0_28 = arith.constant 0 : index
    %c0_29 = arith.constant 0 : index
    %61 = vector.load %arg9[%c0_28, %c0_29] : memref<1x256xf32, #tpu.memory_space<vmem>>, vector<1x256xf32>
    %62 = arith.select %57, %55, %61 : vector<1x256xi1>, vector<1x256xf32>
    %c0_30 = arith.constant 0 : index
    %c0_31 = arith.constant 0 : index
    %63 = vector.load %arg9[%c0_30, %c0_31] : memref<1x256xf32, #tpu.memory_space<vmem>>, vector<1x256xf32>
    tpu.vector_store %arg9[%c0_30, %c0_31], %62 {strides = array<i32>} : memref<1x256xf32, #tpu.memory_space<vmem>>, vector<1x256xf32>,
    %c1_i32 = arith.constant 1 : i32
    %64 = arith.cmpi eq, %arg1, %c1_i32 : i32
    %65 = arith.extui %64 : i1 to i32
    %c0_i32_32 = arith.constant 0 : i32
    %66 = arith.cmpi ne, %65, %c0_i32_32 : i32
    scf.if %66 {
      %c0_33 = arith.constant 0 : index
      %c0_34 = arith.constant 0 : index
      %67 = vector.load %arg9[%c0_33, %c0_34] : memref<1x256xf32, #tpu.memory_space<vmem>>, vector<1x256xf32>
      %cst_35 = arith.constant 1.000000e+00 : f32
      %68 = vector.broadcast %cst_35 : f32 to vector<1x256xf32>
      %69 = arith.subf %68, %67 : vector<1x256xf32>
      %cst_36 = arith.constant 2.000000e+00 : f32
      %70 = vector.broadcast %cst_36 : f32 to vector<1x256xf32>
      %71 = arith.mulf %69, %70 : vector<1x256xf32>
      %72 = math.exp %71 : vector<1x256xf32>
      %c0_37 = arith.constant 0 : index
      %c0_38 = arith.constant 0 : index
      %73 = vector.load %arg8[%c0_37, %c0_38] : memref<1x256xf32, #tpu.memory_space<vmem>>, vector<1x256xf32>
      %74 = arith.mulf %73, %72 : vector<1x256xf32>
      %75 = vector.shape_cast %74 : vector<1x256xf32> to vector<1x1x256xf32>
      %cst_39 = arith.constant dense<0.000000e+00> : vector<1xf32>
      %76 = vector.multi_reduction <add>, %75, %cst_39 [1, 2] : vector<1x1x256xf32> to vector<1xf32>
      %77 = vector.shape_cast %76 : vector<1xf32> to vector<1x1x1xf32>
      %78 = vector.extract %77[0, 0, 0] : f32 from vector<1x1x1xf32>
      %79 = vector.shape_cast %72 : vector<1x256xf32> to vector<1x1x256xf32>
      %cst_40 = arith.constant dense<0.000000e+00> : vector<1xf32>
      %80 = vector.multi_reduction <add>, %79, %cst_40 [1, 2] : vector<1x1x256xf32> to vector<1xf32>
      %81 = vector.shape_cast %80 : vector<1xf32> to vector<1x1x1xf32>
      %82 = vector.extract %81[0, 0, 0] : f32 from vector<1x1x1xf32>
      %c0_41 = arith.constant 0 : index
      %c0_42 = arith.constant 0 : index
      %c0_43 = arith.constant 0 : index
      %83 = vector.load %arg5[%c0_41, %c0_42, %c0_43] : memref<1x1x256xf32, #tpu.memory_space<vmem>>, vector<1x1x256xf32>
      %84 = vector.shape_cast %83 : vector<1x1x256xf32> to vector<1x256xf32>
      %85 = vector.shape_cast %72 : vector<1x256xf32> to vector<1x1x256xf32>
      tpu.vector_store %arg5[%c0_41, %c0_42, %c0_43], %85 {strides = array<i32>} : memref<1x1x256xf32, #tpu.memory_space<vmem>>, vector<1x1x256xf32>,
      %86 = arith.divf %78, %82 : f32
      %87 = vector.broadcast %86 : f32 to vector<1x1xf32>
      %c0_44 = arith.constant 0 : index
      %c0_45 = arith.constant 0 : index
      %c0_46 = arith.constant 0 : index
      %88 = vector.load %arg6[%c0_44, %c0_45, %c0_46] : memref<1x1x1xf32, #tpu.memory_space<vmem>>, vector<1x1x1xf32>
      %89 = vector.shape_cast %88 : vector<1x1x1xf32> to vector<1x1xf32>
      %90 = vector.shape_cast %87 : vector<1x1xf32> to vector<1x1x1xf32>
      tpu.vector_store %arg6[%c0_44, %c0_45, %c0_46], %90 {strides = array<i32>} : memref<1x1x1xf32, #tpu.memory_space<vmem>>, vector<1x1x1xf32>,
    } else {
    }
    return
  }
  func.func @transform_0(%arg0: i32, %arg1: i32) -> (i32, i32) {
    %c0_i32 = arith.constant 0 : i32
    %c0_i32_0 = arith.constant 0 : i32
    %c0_i32_1 = arith.constant 0 : i32
    return %c0_i32, %c0_i32_0 : i32, i32
  }
  func.func @transform_1(%arg0: i32, %arg1: i32) -> (i32, i32, i32) {
    %c0_i32 = arith.constant 0 : i32
    %c0_i32_0 = arith.constant 0 : i32
    return %arg0, %c0_i32, %arg1 : i32, i32, i32
  }
  func.func @transform_2(%arg0: i32, %arg1: i32) -> (i32, i32, i32) {
    %c0_i32 = arith.constant 0 : i32
    %c0_i32_0 = arith.constant 0 : i32
    %c0_i32_1 = arith.constant 0 : i32
    return %arg0, %c0_i32, %c0_i32_0 : i32, i32, i32
  }
  func.func @transform_3(%arg0: i32, %arg1: i32) -> (i32, i32, i32) {
    %c0_i32 = arith.constant 0 : i32
    %c0_i32_0 = arith.constant 0 : i32
    %c0_i32_1 = arith.constant 0 : i32
    return %arg0, %c0_i32, %c0_i32_0 : i32, i32, i32
  }
  func.func @transform_4(%arg0: i32, %arg1: i32) -> (i32, i32, i32) {
    %c0_i32 = arith.constant 0 : i32
    %c0_i32_0 = arith.constant 0 : i32
    %c0_i32_1 = arith.constant 0 : i32
    return %arg0, %c0_i32, %c0_i32_0 : i32, i32, i32
  }
}

</mosaic_0001>

<bundles_post_ra>
// kernel: tpu_custom_call.1
= control target key start
LH: loop header
LB: loop body
LE: loop exit
PB: predicated region body
PF: predicated region fallthrough
CT: control target
= control target key end

     0   :  { %s3215_s0 = inlined_call_operand.vmem [shape: f32[8,1], index: 0, kind: input, shape index: {}]   ;;  %s3216_s1 = inlined_call_operand.hbm [shape: f32[2,8,256], index: 1, kind: input, shape index: {}]   ;;  %s3217_s2 = inlined_call_operand.hbm [shape: f32[2,8,256], index: 2, kind: input, shape index: {}]   ;;  %s3218_s3 = inlined_call_operand.hbm [shape: f32[2,1,256], index: 3, kind: output, shape index: {0}]   ;;  %s3219_s4 = inlined_call_operand.vmem [shape: f32[2,1,1], index: 4, kind: output, shape index: {1}]  }
   0x1   :  { %3271 = sst [smem:[#allocation52_spill]] %s3215_s0 }
   0x2   :  { %3272 = sst [smem:[#allocation53_spill]] %s3218_s3 }
   0x3   :  { %10 = vsyncpa [#allocation6], 0 }
   0x4   :  { %12 = vsyncpa [#allocation6 + $0x1], 0 }
   0x5   :  { %13 = vsyncpa [#allocation9], 0 }
   0x6   :  { %15 = vsyncpa [#allocation9 + $0x1], 0 }
   0x7   :  { %16 = vsyncpa [#allocation7], 0 }
   0x8   :  { %18 = vsyncpa [#allocation7 + $0x1], 0  ;;  %s2108_s15 = smov 0   ;;  %s2110_s16 = smov 0  }
   0x9   :  { %s2112_s17 = smov 0   ;;  %s2114_s18 = smov 0  }
   0xa   :  { %s2116_s19 = smov 0   ;;  %s2118_s20 = smov 0  }
   0xb   :  { %s2120_s21 = smov 0   ;;  %s2122_s22 = smov 0  }
   0xc   :  { %s2124_s23 = smov 0   ;;  %s2126_s24 = smov 0  }
   0xd   :  { %s2128_s25 = smov 0  }
   0xe LB: > { %3273 = sst [smem:[#allocation14_spill]] %s2056_s21  ;;  %s3220_s26 = sadd.s32 4294967295, %s2072_s25   ;;  %s2072_s25 = sphi %s2128_s25, %s24_s25   ;;  %s2068_s24 = sphi %s2126_s24, %s3401_s24   ;;  %s2064_s23 = sphi %s2124_s23, %s3400_s23   ;;  %s2060_s22 = sphi %s2122_s22, %s3399_s22   ;;  %s2056_s21 = sphi %s2120_s21, %s3398_s21   ;;  %s2052_s20 = sphi %s2118_s20, %s3397_s20   ;;  %s2048_s19 = sphi %s2116_s19, %s3396_s19   ;;  %s2044_s18 = sphi %s2114_s18, %s3395_s18   ;;  %s2040_s17 = sphi %s2112_s17, %s3394_s17   ;;  %s2036_s16 = sphi %s2110_s16, %s3393_s16   ;;  %s2032_s15 = sphi %s2108_s15, %s3392_s15  }
   0xf   : > { %s33_s27 = sadd.s32 1, %s2064_s23  ;;  %s36_s28 = sadd.s32 1, %s2068_s24 }
  0x10   : > { %p34_p0 = scmp.ge.s32.totalorder %s33_s27, 2  ;;  %s66_s29 = sadd.s32 1, %s2052_s20 }
  0x11   : > { %p73_p1 = scmp.ne.s32.totalorder %s2052_s20, %s2048_s19  ;;  %p3225_p2 = scmp.eq.s32.totalorder %s2072_s25, 0 }
  0x12   : > { %s3403_s27 = smov (%p34_p0, %s33_s27), 0  ;;  %s3405_s28 = smov (!%p34_p0, %s36_s28), %s2068_s24 }
  0x13   : > { %3274 = sst [smem:[#allocation15_spill]] %s3403_s27  ;;  %s62_s30 = ssub.s32 %s2064_s23, %s3403_s27 }
  0x14   : > { %p38_p3 = scmp.ge.s32.totalorder %s3405_s28, 2  ;;  %p79_p4 = scmp.ne.s32.totalorder %s2048_s19, %s2044_s18 }
  0x15   : > { %p2176_p5 = por %p3225_p2, %p73_p1  ;;  %p2182_p6 = scmp.eq.s32.totalorder %s3220_s26, 0 }
  0x16   : > { %s3407_s28 = smov (%p38_p3, %s3405_s28), 0  ;;  %p3224_p8 = scmp.lt.s32.totalorder %s2072_s25, 4 }
  0x17   : > { %3277 = sst [smem:[#allocation16_spill]] %s3407_s28  ;;  %p2190_p7 = por %p2182_p6, %p79_p4 }
  0x18   : > { %s2196_s8 = ssub.s32 %s2068_s24, %s3407_s28  ;;  %s184_s10 = sand.u32 1, %s2052_s20  }
  0x19   : > { %s3278_s7 = scalar_select %p2190_p7, 1, 0 }
  0x1a   : > { %s63_s9 = sor.u32 %s62_s30, %s2196_s8  ;;  %s1590_s11 = sshll.u32 %s184_s10, 3 }
  0x1b   : > { %p64_p10 = scmp.eq.s32.totalorder %s63_s9, 0  ;;  %s1591_s13 = sshll.u32 %s2068_s24, 1 }
  0x1c   : > { %s193_s14 = sadd.s32 %s2064_s23, %s1591_s13  ;;  %s188_s18 = scalar_lea.vmem [#allocation5], %s1590_s11 }
  0x1d   : > { %s2203_s12 = scalar_select %p64_p10, %s2052_s20, %s66_s29  }
  0x1e   : > { %s197_s26 = sshll.u32 %s188_s18, 4  ;;  %s1592_s27 = sshll.u32 %s193_s14, 7  ;;  %s2207_s26 = int_to_ptr.vmem [resolvable:$true] %s197_s26 }
  0x1f   : > { %s2212_s21 = scalar_lea.hbm %s3216_s1, %s1592_s27  ;;  %p2218_p11 = pnand %p3224_p8, %p2176_p5 }
  0x20   : > { %s185_s30 = scalar_lea.sflag [#allocation6], %s184_s10  ;;  %s1886_s9 = scalar_lea.hbm %s2212_s21, 128 }
  0x21   : > { %p1887_p0 = scmp.ne.s32.totalorder %s2212_s21, %s1886_s9  ;;  %p1888_p1 = pneg %p2218_p11 }
  0x22   : > { %s1891_s28 = scalar_lea.hbm %s3216_s1, 512  ;;  %p1892_p5 = scmp.lt.u32.totalorder %s2212_s21, %s3216_s1 }
  0x23   : > { %p1889_p3 = pnand %p1888_p1, %p1887_p0  ;;  %p1893_p10 = scmp.lt.u32.totalorder %s1891_s28, %s1886_s9 }
  0x24   : > { %p1895_p2 = scmp.lt.u32.totalorder %s1886_s9, %s2212_s21 }
  0x25   : > { %p1890_p4 = pneg %p1889_p3  ;;  %p1894_p8 = por %p1893_p10, %p1892_p5 }
  0x27   : > { %p1896_p9 = por %p1895_p2, %p1894_p8 }
  0x29   : > { %p1897_p12 = pnand %p1896_p9, %p1890_p4 }
  0x2b   : > { %1900 = shalt.err (!%p1897_p12)
}
  0x2c   : > { %s1901_s10 = scalar_lea.vmem %s2207_s26, 128  ;;  %s2074_s13 = smov [#allocation5]  }
  0x2d   : > { %p1902_p0 = scmp.ne.s32.totalorder %s2207_s26, %s1901_s10  ;;  %s1906_s14 = sshll.u32 %s2074_s13, 4  ;;  %s1907_s14 = int_to_ptr.vmem [resolvable:$false] %s1906_s14 }
  0x2e   : > { %s1908_s18 = scalar_lea.vmem %s1907_s14, 256  ;;  %p1909_p7 = scmp.lt.s32.totalorder %s2207_s26, %s1907_s14 }
  0x2f   : > { %p1904_p3 = pnand %p1902_p0, %p1888_p1  ;;  %p1910_p5 = scmp.lt.s32.totalorder %s1908_s18, %s1901_s10 }
  0x31   : > { %p1905_p13 = pneg %p1904_p3  ;;  %p1911_p10 = por %p1910_p5, %p1909_p7 }
  0x33   : > { %p1912_p2 = pnand %p1911_p10, %p1905_p13 }
  0x35   : > { %1915 = shalt.err (!%p1912_p2)
}
  0x36   : > { %1642 = dma.hbm_to_vmem [thread:$0]  (!%p2218_p11), %s2212_s21, 128, %s2207_s26, %s185_s30  }
  0x37   : > { %p3280_p7 = scmp.lt.s32.totalorder %s2072_s25, 5  ;;  %p3281_p8 = scmp.ge.s32.totalorder %s2072_s25, 1 }
  0x38   : > { %s1587_s9 = sadd.s32 4294967294, %s2072_s25   ;;  %s92_s3 = sadd.s32 1, %s2040_s17 }
  0x39   : > { %p2253_p9 = pnand %p3281_p8, %p3280_p7  ;;  %p3283_p12 = scmp.eq.s32.totalorder %s2196_s8, 0 }
  0x3a   : > { %p99_p13 = scmp.ne.s32.totalorder %s2040_s17, %s2036_s16  ;;  %p105_p1 = scmp.ne.s32.totalorder %s2036_s16, %s2032_s15 }
  0x3b   : > { %s2262_s27 = scalar_select %p3283_p12, %s2040_s17, %s92_s3  }
  0x3c   : > { %s3284_s28 = sadd.s32 4294967295, %s2072_s25   ;;  %p135_p0 = scmp.eq.s32.totalorder %s1587_s9, 3 }
  0x3d   : > { %p129_p4 = scmp.eq.s32.totalorder %s3284_s28, 3  ;;  %p3285_p3 = scmp.eq.s32.totalorder %s2072_s25, 0 }
  0x3e   : > { %p2274_p11 = por %p105_p1, %p2182_p6  ;;  %p2282_p2 = por %p135_p0, %p105_p1 }
  0x3f   : > { %p101_p5 = por %p99_p13, %p3285_p3  ;;  %p2278_p10 = por %p129_p4, %p99_p13 }
  0x40   : > { %s3286_s21 = scalar_select %p2274_p11, 1, 0 }
  0x41   : > { %s3287_s26 = scalar_select %p2278_p10, 1, 0 }
  0x42   : > { %s3288_s8 = scalar_select %p2282_p2, 1, 0 }
  0x43   : > { %s204_s30 = sand.u32 1, %s2040_s17   ;;  %s1623_s5 = sshll.u32 %s2068_s24, 8 }
  0x44   : > { %s1593_s11 = sshll.u32 %s204_s30, 4  ;;  %s2291_s14 = scalar_lea.hbm %s3217_s2, %s1623_s5 }
  0x45   : > { %s208_s6 = scalar_lea.vmem [#allocation8], %s1593_s11  ;;  %p3289_p6 = scmp.lt.s32.totalorder %s2072_s25, 4 }
  0x46   : > { %s216_s18 = sshll.u32 %s208_s6, 4  ;;  %s205_s3 = scalar_lea.sflag [#allocation9], %s204_s30  ;;  %s2299_s18 = int_to_ptr.vmem [resolvable:$true] %s216_s18 }
  0x47   : > { %p2295_p7 = pnand %p3289_p6, %p101_p5  ;;  %s1916_s28 = scalar_lea.hbm %s2291_s14, 256 }
  0x48   : > { %p1917_p8 = scmp.ne.s32.totalorder %s2291_s14, %s1916_s28  ;;  %s1921_s10 = scalar_lea.hbm %s3217_s2, 512 }
  0x49   : > { %p1918_p12 = pneg %p2295_p7  ;;  %p1922_p4 = scmp.lt.u32.totalorder %s2291_s14, %s3217_s2 }
  0x4a   : > { %p1923_p0 = scmp.lt.u32.totalorder %s1921_s10, %s1916_s28  ;;  %p1925_p5 = scmp.lt.u32.totalorder %s1916_s28, %s2291_s14 }
  0x4b   : > { %p1919_p13 = pnand %p1918_p12, %p1917_p8 }
  0x4c   : > { %p1924_p3 = por %p1923_p0, %p1922_p4 }
  0x4d   : > { %p1920_p1 = pneg %p1919_p13 }
  0x4e   : > { %p1926_p6 = por %p1925_p5, %p1924_p3 }
  0x50   : > { %p1927_p2 = pnand %p1926_p6, %p1920_p1 }
  0x52   : > { %1930 = shalt.err (!%p1927_p2)
}
  0x53   : > { %s1931_s30 = scalar_lea.vmem %s2299_s18, 256  ;;  %s2075_s5 = smov [#allocation8]  }
  0x54   : > { %p1932_p8 = scmp.ne.s32.totalorder %s2299_s18, %s1931_s30  ;;  %s1936_s11 = sshll.u32 %s2075_s5, 4  ;;  %s1937_s11 = int_to_ptr.vmem [resolvable:$false] %s1936_s11 }
  0x55   : > { %s1938_s13 = scalar_lea.vmem %s1937_s11, 512  ;;  %p1939_p11 = scmp.lt.s32.totalorder %s2299_s18, %s1937_s11 }
  0x56   : > { %p1934_p13 = pnand %p1932_p8, %p1918_p12  ;;  %p1940_p4 = scmp.lt.s32.totalorder %s1938_s13, %s1931_s30 }
  0x58   : > { %p1935_p10 = pneg %p1934_p13  ;;  %p1941_p0 = por %p1940_p4, %p1939_p11 }
  0x5a   : > { %p1942_p3 = pnand %p1941_p0, %p1935_p10 }
  0x5c   : > { %1945 = shalt.err (!%p1942_p3)
}
  0x5d   : > { %1645 = dma.hbm_to_vmem [thread:$0]  (!%p2295_p7), %s2291_s14, 256, %s2299_s18, %s205_s3  }
  0x5e   : > { %225 = sbr.rel (%p2253_p9) target bundleno = 1632 (0x660), region = 32 }
  0x65   : > { %s227_s28 = sand.u32 1, %s2048_s19   ;;  %p3291_p2 = scmp.ne.s32.totalorder %s3278_s7, 0 }
  0x66   : > { %s2329_s10 = sshll.u32 %s227_s28, 3  ;;  %s228_s6 = scalar_lea.sflag [#allocation6], %s227_s28 }
  0x67   : > { %s231_s5 = scalar_lea.vmem [#allocation5], %s2329_s10 }
  0x68   : > { %2019 = dma.done.wait (%p3291_p2), %s228_s6, 128  }
  0x69   : > { %2021 = vsyncadd (%p3291_p2), %s228_s6, 4294967168  ;;  %s2337_s9 = sand.u32 1, %s2036_s16   ;;  %p3292_p9 = scmp.ne.s32.totalorder %s3286_s21, 0 }
  0x6a   : > { %s1598_s29 = sshll.u32 %s2337_s9, 4  ;;  %s237_s14 = scalar_lea.sflag [#allocation9], %s2337_s9 }
  0x6b   : > { %s240_s18 = scalar_lea.vmem [#allocation8], %s1598_s29 }
  0x6c   : > { %2023 = dma.done.wait (%p3292_p9), %s237_s14, 256  }
  0x6d   : > { %2025 = vsyncadd (%p3292_p9), %s237_s14, 4294967040  ;;  %s1599_s3 = sshll.u32 %s2337_s9, 1  ;;  %p273_p11 = scmp.lt.s32.totalorder %s2060_s22, 1 }
  0x6e   : > { %s3293_s0 = sld [smem:[#allocation52_spill]]  ;;  %s2357_s29 = scalar_lea.vmem [#allocation10], %s1599_s3 }
  0x6f   : > { %s2348_s7 = scalar_select %p273_p11, %s2060_s22, 1 }
  0x70   : > { %s3294_s21 = sld [smem:[#allocation14_spill]] }
  0x71   : > { %s275_s13 = scalar_lea.vmem %s3219_s4, %s2348_s7 }
  0x74   : > { %v276_v0 = vld [vmem:[%s3293_s0] sm:$0xff] }
  0x76   : > { %p1600_p10 = scmp.ne.s32.totalorder %s3294_s21, 0 }
  0x77   : > { %v2076_v1 = vmov (!%p1600_p10), 0   ;;  %v312_v2 = vlaneseq (!%p1600_p10)  ;;  %v2077_v3 = vmov (!%p1600_p10), -inf   ;;  %v2078_v4 = vmov (!%p1600_p10), 0.0   ;;  %v281_v5 = vld [vmem:[%s240_s18] sm:$0xff] (!%p1600_p10)  ;;  %v282_v6 = vld [vmem:[%s240_s18 + $0x8] sm:$0xff] (!%p1600_p10) }
  0x78   : > { %280 = sbr.rel (%p1600_p10) target bundleno = 282 (0x11a), region = 44  ;;  %1746 = vset.pattern.permute.xlu0 (!%p1600_p10), %v2076_v1 }
  0x79   : > { %285 = vperm.xlu0 (!%p1600_p10), %1746, %v276_v0   ;;  %vm314_vm0 = vcmp.lt.s32.totalorder (!%p1600_p10), %v312_v2, 256 }
  0x7a   : > { %316 = vst.msk [vmem:[#allocation3] sm:$0x3] (!%p1600_p10), %vm314_vm0, %v2077_v3  ;;  %317 = vst.msk [vmem:[#allocation4] sm:$0x3] (!%p1600_p10), %vm314_vm0, %v2078_v4 }
  0xf8   : > { %v286_v7 = vpop.permute.xlu0 %285 }
  0xf9   : > { %v288_v8 = vsub.f32 %v281_v5, %v286_v7  ;;  %v289_v9 = vsub.f32 %v282_v6, %v286_v7 }
  0xfb   : > { %v290_v10 = vmul.f32 %v288_v8, %v288_v8  ;;  %v291_v11 = vmul.f32 %v289_v9, %v289_v9 }
  0xfd   : > { %v292_v12 = vrot.slane %v290_v10, 4  ;;  %v298_v13 = vrot.slane %v291_v11, 4 }
  0xff   : > { %v293_v14 = vadd.f32 %v292_v12, %v290_v10  ;;  %v299_v15 = vadd.f32 %v298_v13, %v291_v11 }
 0x101   : > { %v294_v16 = vrot.slane %v293_v14, 2  ;;  %v300_v17 = vrot.slane %v299_v15, 2 }
 0x103   : > { %v295_v18 = vadd.f32 %v294_v16, %v293_v14  ;;  %v301_v19 = vadd.f32 %v300_v17, %v299_v15 }
 0x105   : > { %v296_v20 = vrot.slane %v295_v18, 1  ;;  %v302_v21 = vrot.slane %v301_v19, 1 }
 0x107   : > { %v297_v22 = vadd.f32 %v296_v20, %v295_v18  ;;  %v303_v23 = vadd.f32 %v302_v21, %v301_v19 }
 0x109   : > { %v304_v24 = vmax.f32 %v297_v22, 1e-24  ;;  %v305_v25 = vmax.f32 %v303_v23, 1e-24 }
 0x10b   : > { %1747 = vrsqrt.f32 %v304_v24 }
 0x10c   : > { %1749 = vrsqrt.f32 %v305_v25 }
 0x115   : > { %v1748_v26 = vpop.eup %1747 }
 0x116   : > { %v1750_v27 = vpop.eup %1749  ;;  %v308_v28 = vmul.f32 %v1748_v26, %v288_v8 }
 0x117   : > { %v309_v29 = vmul.f32 %v1750_v27, %v289_v9 }
 0x118   : > { %310 = vst [vmem:[#allocation2] sm:$0xff] %v308_v28 }
 0x119   : > { %311 = vst [vmem:[#allocation2 + $0x8] sm:$0xff] %v309_v29 }
 0x11a PF: > { %v2079_v30 = vmov 0   ;;  %v2080_v33 = vmov 0.0   ;;  %v318_v34 = vld [vmem:[%s231_s5] sm:$0xff]  ;;  %vm369_vm1 = vcmask 64512   ;;  %s3384_s10 = sld [smem:[#allocation14_spill]] }
 0x11b   : > { %1751 = vset.pattern.permute.xlu0 %v2079_v30  ;;  %482 = vmatprep.mubr.f32.mxu0 %v2080_v33 }
 0x11c   : > { %321 = vperm.xlu0 %1751, %v276_v0   ;;  %530 = vmatprep.mubr.f32.mxu1 %v2080_v33 }
 0x11f   : > { %v335_v32 = vld [vmem:[#allocation2] sm:$0xff] }
 0x120   : > { %v336_v31 = vld [vmem:[#allocation2 + $0x8] sm:$0xff]  ;;  %p1617_p7 = scmp.ne.s32.totalorder %s3384_s10, 1 }
 0x121   : > { %418 = vmatprep.subr.mxu0 %v336_v31  ;;  %1625 = vmatprep.subr.mxu1 %v336_v31 }
 0x122   : > { %419 = vmatpush1.msra.mxu0 %v335_v32  ;;  %1626 = vmatpush1.msra.mxu1 %v335_v32 }
 0x19b   : > { %v322_v35 = vpop.permute.xlu0 %321 }
 0x19c   : > { %v324_v36 = vsub.f32 %v318_v34, %v322_v35 }
 0x19e   : > { %v325_v37 = vmul.f32 %v324_v36, %v324_v36 }
 0x1a0   : > { %v326_v38 = vrot.slane %v325_v37, 4 }
 0x1a2   : > { %v327_v39 = vadd.f32 %v326_v38, %v325_v37 }
 0x1a4   : > { %v328_v40 = vrot.slane %v327_v39, 2 }
 0x1a6   : > { %v329_v41 = vadd.f32 %v328_v40, %v327_v39 }
 0x1a8   : > { %v330_v42 = vrot.slane %v329_v41, 1 }
 0x1aa   : > { %v331_v43 = vadd.f32 %v330_v42, %v329_v41 }
 0x1ac   : > { %v332_v44 = vmax.f32 %v331_v43, 1e-24 }
 0x1ae   : > { %1752 = vrsqrt.f32 %v332_v44 }
 0x1b8   : > { %v1753_v45 = vpop.eup %1752 }
 0x1b9   : > { %v334_v46 = vmul.f32 %v1753_v45, %v324_v36 }
 0x1bb   : > { %337 = vxpose.xlu0.b32.start.end [1/1] (short) %v334_v46, 128 }
 0x23b   : > { %v353_v47 = vpop.trf.xlu0 }
 0x23c   : > { %1601 = vmatmul.mubr.msk.f32.vlgmr.msra.gmra.mrb[0].mxu0 %vm369_vm1, %v353_v47 }
 0x23d   : > { %488 = vmatprep.mubr.f32.mxu0 %v2080_v33 }
 0x23f   : > { %v354_v48 = vpop.trf.xlu0 }
 0x240   : > { %1602 = vmatmul.mubr.msk.f32.gmra.mrb[2].mxu0 %vm369_vm1, %v354_v48 }
 0x241   : > { %494 = vmatprep.mubr.f32.mxu0 %v2080_v33 }
 0x243   : > { %v355_v49 = vpop.trf.xlu0 }
 0x244   : > { %1603 = vmatmul.mubr.msk.f32.gmra.mrb[4].mxu0 %vm369_vm1, %v355_v49 }
 0x245   : > { %500 = vmatprep.mubr.f32.mxu0 %v2080_v33 }
 0x247   : > { %v356_v50 = vpop.trf.xlu0 }
 0x248   : > { %1604 = vmatmul.mubr.msk.f32.gmra.mrb[6].mxu0 %vm369_vm1, %v356_v50 }
 0x249   : > { %506 = vmatprep.mubr.f32.mxu0 %v2080_v33 }
 0x24b   : > { %v357_v51 = vpop.trf.xlu0 }
 0x24c   : > { %1605 = vmatmul.mubr.msk.f32.gmra.mrb[8].mxu0 %vm369_vm1, %v357_v51 }
 0x24d   : > { %512 = vmatprep.mubr.f32.mxu0 %v2080_v33 }
 0x24f   : > { %v358_v52 = vpop.trf.xlu0 }
 0x250   : > { %1606 = vmatmul.mubr.msk.f32.gmra.mrb[10].mxu0 %vm369_vm1, %v358_v52 }
 0x251   : > { %518 = vmatprep.mubr.f32.mxu0 %v2080_v33 }
 0x253   : > { %v359_v53 = vpop.trf.xlu0 }
 0x254   : > { %1607 = vmatmul.mubr.msk.f32.gmra.mrb[12].mxu0 %vm369_vm1, %v359_v53 }
 0x255   : > { %524 = vmatprep.mubr.f32.mxu0 %v2080_v33 }
 0x257   : > { %v360_v54 = vpop.trf.xlu0 }
 0x258   : > { %1608 = vmatmul.mubr.msk.f32.gmra.mrb[14].mxu0 %vm369_vm1, %v360_v54 }
 0x25b   : > { %v361_v55 = vpop.trf.xlu0 }
 0x25c   : > { %1609 = vmatmul.mubr.msk.f32.vlgmr.msra.gmra.mrb[0].mxu1 %vm369_vm1, %v361_v55 }
 0x25d   : > { %536 = vmatprep.mubr.f32.mxu1 %v2080_v33 }
 0x25f   : > { %v362_v56 = vpop.trf.xlu0 }
 0x260   : > { %1610 = vmatmul.mubr.msk.f32.gmra.mrb[2].mxu1 %vm369_vm1, %v362_v56 }
 0x261   : > { %542 = vmatprep.mubr.f32.mxu1 %v2080_v33 }
 0x263   : > { %v363_v57 = vpop.trf.xlu0 }
 0x264   : > { %1611 = vmatmul.mubr.msk.f32.gmra.mrb[4].mxu1 %vm369_vm1, %v363_v57 }
 0x265   : > { %548 = vmatprep.mubr.f32.mxu1 %v2080_v33 }
 0x267   : > { %v364_v58 = vpop.trf.xlu0 }
 0x268   : > { %1612 = vmatmul.mubr.msk.f32.gmra.mrb[6].mxu1 %vm369_vm1, %v364_v58 }
 0x269   : > { %554 = vmatprep.mubr.f32.mxu1 %v2080_v33 }
 0x26b   : > { %v365_v59 = vpop.trf.xlu0 }
 0x26c   : > { %1613 = vmatmul.mubr.msk.f32.gmra.mrb[8].mxu1 %vm369_vm1, %v365_v59 }
 0x26d   : > { %560 = vmatprep.mubr.f32.mxu1 %v2080_v33 }
 0x26f   : > { %v366_v60 = vpop.trf.xlu0 }
 0x270   : > { %1614 = vmatmul.mubr.msk.f32.gmra.mrb[10].mxu1 %vm369_vm1, %v366_v60 }
 0x271   : > { %566 = vmatprep.mubr.f32.mxu1 %v2080_v33 }
 0x273   : > { %v367_v61 = vpop.trf.xlu0 }
 0x274   : > { %1615 = vmatmul.mubr.msk.f32.gmra.mrb[12].mxu1 %vm369_vm1, %v367_v61 }
 0x275   : > { %572 = vmatprep.mubr.f32.mxu1 %v2080_v33 }
 0x277   : > { %v368_v62 = vpop.trf.xlu0 }
 0x278   : > { %1616 = vmatmul.mubr.msk.f32.gmra.mrb[14].mxu1 %vm369_vm1, %v368_v62 }
 0x30f   : > { %v484_v63 = vpop.f32.mrb[0].mxu0 }
 0x310   : > { %v579_v0 = vsub.f32 1.0, %v484_v63  ;;  %v486_v1 = vpop.f32.mrb[1].mxu0 }
 0x311   : > { %v580_v2 = vsub.f32 1.0, %v486_v1 }
 0x312   : > { %v2394_v3 = vmax.f32 %v579_v0, 0.0 }
 0x313   : > { %v2396_v4 = vmax.f32 %v580_v2, 0.0  ;;  %v490_v5 = vpop.f32.mrb[2].mxu0 }
 0x314   : > { %v581_v6 = vsub.f32 1.0, %v490_v5  ;;  %v492_v7 = vpop.f32.mrb[3].mxu0 }
 0x315   : > { %v582_v8 = vsub.f32 1.0, %v492_v7  ;;  %v643_v9 = vmin.f32 %v2394_v3, %v2396_v4 }
 0x316   : > { %v2400_v10 = vmax.f32 %v581_v6, 0.0 }
 0x317   : > { %v2402_v11 = vmax.f32 %v582_v8, 0.0  ;;  %644 = vmin.xlane.f32.xlu1 %v643_v9  ;;  %v496_v12 = vpop.f32.mrb[4].mxu0 }
 0x318   : > { %v583_v13 = vsub.f32 1.0, %v496_v12  ;;  %v498_v14 = vpop.f32.mrb[5].mxu0 }
 0x319   : > { %3295 = vst [vmem:[#allocation17_spill] sm:$0xff] %v2402_v11  ;;  %v584_v15 = vsub.f32 1.0, %v498_v14  ;;  %v646_v16 = vmin.f32 %v2400_v10, %v2402_v11 }
 0x31a   : > { %v2406_v17 = vmax.f32 %v583_v13, 0.0 }
 0x31b   : > { %v2408_v18 = vmax.f32 %v584_v15, 0.0  ;;  %647 = vmin.xlane.f32.xlu1 %v646_v16  ;;  %v502_v19 = vpop.f32.mrb[6].mxu0 }
 0x31c   : > { %3296 = vst [vmem:[#allocation18_spill] sm:$0xff] %v2406_v17  ;;  %v585_v20 = vsub.f32 1.0, %v502_v19  ;;  %v504_v21 = vpop.f32.mrb[7].mxu0 }
 0x31d   : > { %3297 = vst [vmem:[#allocation19_spill] sm:$0xff] %v2408_v18  ;;  %v586_v22 = vsub.f32 1.0, %v504_v21  ;;  %v649_v23 = vmin.f32 %v2406_v17, %v2408_v18 }
 0x31e   : > { %v2412_v24 = vmax.f32 %v585_v20, 0.0 }
 0x31f   : > { %v2414_v25 = vmax.f32 %v586_v22, 0.0  ;;  %650 = vmin.xlane.f32.xlu1 %v649_v23  ;;  %v508_v26 = vpop.f32.mrb[8].mxu0 }
 0x320   : > { %3298 = vst [vmem:[#allocation20_spill] sm:$0xff] %v2412_v24  ;;  %v587_v27 = vsub.f32 1.0, %v508_v26  ;;  %v510_v28 = vpop.f32.mrb[9].mxu0 }
 0x321   : > { %3299 = vst [vmem:[#allocation21_spill] sm:$0xff] %v2414_v25  ;;  %v588_v29 = vsub.f32 1.0, %v510_v28  ;;  %v652_v30 = vmin.f32 %v2412_v24, %v2414_v25 }
 0x322   : > { %v2418_v31 = vmax.f32 %v587_v27, 0.0 }
 0x323   : > { %v2420_v32 = vmax.f32 %v588_v29, 0.0  ;;  %653 = vmin.xlane.f32.xlu1 %v652_v30  ;;  %v514_v33 = vpop.f32.mrb[10].mxu0 }
 0x324   : > { %3300 = vst [vmem:[#allocation22_spill] sm:$0xff] %v2418_v31  ;;  %v589_v34 = vsub.f32 1.0, %v514_v33  ;;  %v516_v35 = vpop.f32.mrb[11].mxu0 }
 0x325   : > { %3301 = vst [vmem:[#allocation23_spill] sm:$0xff] %v2420_v32  ;;  %v590_v36 = vsub.f32 1.0, %v516_v35  ;;  %v655_v37 = vmin.f32 %v2418_v31, %v2420_v32 }
 0x326   : > { %v2424_v38 = vmax.f32 %v589_v34, 0.0 }
 0x327   : > { %v2426_v39 = vmax.f32 %v590_v36, 0.0  ;;  %656 = vmin.xlane.f32.xlu1 %v655_v37  ;;  %v520_v40 = vpop.f32.mrb[12].mxu0 }
 0x328   : > { %3302 = vst [vmem:[#allocation24_spill] sm:$0xff] %v2424_v38  ;;  %v591_v41 = vsub.f32 1.0, %v520_v40  ;;  %v522_v42 = vpop.f32.mrb[13].mxu0 }
 0x329   : > { %3303 = vst [vmem:[#allocation25_spill] sm:$0xff] %v2426_v39  ;;  %v592_v43 = vsub.f32 1.0, %v522_v42  ;;  %v658_v44 = vmin.f32 %v2424_v38, %v2426_v39 }
 0x32a   : > { %v2430_v45 = vmax.f32 %v591_v41, 0.0 }
 0x32b   : > { %v2432_v46 = vmax.f32 %v592_v43, 0.0  ;;  %659 = vmin.xlane.f32.xlu1 %v658_v44  ;;  %v526_v47 = vpop.f32.mrb[14].mxu0 }
 0x32c   : > { %3304 = vst [vmem:[#allocation26_spill] sm:$0xff] %v2430_v45  ;;  %v593_v48 = vsub.f32 1.0, %v526_v47  ;;  %v528_v49 = vpop.f32.mrb[15].mxu0 }
 0x32d   : > { %3305 = vst [vmem:[#allocation27_spill] sm:$0xff] %v2432_v46  ;;  %v594_v50 = vsub.f32 1.0, %v528_v49  ;;  %v661_v51 = vmin.f32 %v2430_v45, %v2432_v46 }
 0x32e   : > { %v2436_v52 = vmax.f32 %v593_v48, 0.0 }
 0x32f   : > { %v2438_v53 = vmax.f32 %v594_v50, 0.0  ;;  %662 = vmin.xlane.f32.xlu1 %v661_v51  ;;  %v532_v54 = vpop.f32.mrb[0].mxu1 }
 0x330   : > { %3306 = vst [vmem:[#allocation28_spill] sm:$0xff] %v2436_v52  ;;  %v595_v55 = vsub.f32 1.0, %v532_v54  ;;  %v534_v56 = vpop.f32.mrb[1].mxu1 }
 0x331   : > { %3307 = vst [vmem:[#allocation29_spill] sm:$0xff] %v2438_v53  ;;  %v596_v57 = vsub.f32 1.0, %v534_v56  ;;  %v664_v58 = vmin.f32 %v2436_v52, %v2438_v53 }
 0x332   : > { %v2442_v59 = vmax.f32 %v595_v55, 0.0 }
 0x333   : > { %v2444_v60 = vmax.f32 %v596_v57, 0.0  ;;  %665 = vmin.xlane.f32.xlu1 %v664_v58  ;;  %v538_v61 = vpop.f32.mrb[2].mxu1 }
 0x334   : > { %3308 = vst [vmem:[#allocation30_spill] sm:$0xff] %v2442_v59  ;;  %v597_v62 = vsub.f32 1.0, %v538_v61  ;;  %v540_v63 = vpop.f32.mrb[3].mxu1 }
 0x335   : > { %3309 = vst [vmem:[#allocation31_spill] sm:$0xff] %v2444_v60  ;;  %v598_v0 = vsub.f32 1.0, %v540_v63  ;;  %v667_v1 = vmin.f32 %v2442_v59, %v2444_v60 }
 0x336   : > { %v2448_v2 = vmax.f32 %v597_v62, 0.0 }
 0x337   : > { %v2450_v5 = vmax.f32 %v598_v0, 0.0  ;;  %668 = vmin.xlane.f32.xlu1 %v667_v1  ;;  %v544_v6 = vpop.f32.mrb[4].mxu1 }
 0x338   : > { %3310 = vst [vmem:[#allocation32_spill] sm:$0xff] %v2448_v2  ;;  %v599_v7 = vsub.f32 1.0, %v544_v6  ;;  %v546_v8 = vpop.f32.mrb[5].mxu1 }
 0x339   : > { %3311 = vst [vmem:[#allocation33_spill] sm:$0xff] %v2450_v5  ;;  %v600_v9 = vsub.f32 1.0, %v546_v8  ;;  %v670_v12 = vmin.f32 %v2448_v2, %v2450_v5 }
 0x33a   : > { %v2454_v13 = vmax.f32 %v599_v7, 0.0 }
 0x33b   : > { %v2456_v14 = vmax.f32 %v600_v9, 0.0  ;;  %671 = vmin.xlane.f32.xlu0 %v670_v12  ;;  %v550_v15 = vpop.f32.mrb[6].mxu1 }
 0x33c   : > { %3312 = vst [vmem:[#allocation34_spill] sm:$0xff] %v2454_v13  ;;  %v601_v16 = vsub.f32 1.0, %v550_v15  ;;  %v552_v19 = vpop.f32.mrb[7].mxu1 }
 0x33d   : > { %3313 = vst [vmem:[#allocation35_spill] sm:$0xff] %v2456_v14  ;;  %v602_v20 = vsub.f32 1.0, %v552_v19  ;;  %v673_v21 = vmin.f32 %v2454_v13, %v2456_v14 }
 0x33e   : > { %v2460_v22 = vmax.f32 %v601_v16, 0.0 }
 0x33f   : > { %v2462_v23 = vmax.f32 %v602_v20, 0.0  ;;  %674 = vmin.xlane.f32.xlu1 %v673_v21  ;;  %v556_v26 = vpop.f32.mrb[8].mxu1 }
 0x340   : > { %3314 = vst [vmem:[#allocation36_spill] sm:$0xff] %v2460_v22  ;;  %v603_v27 = vsub.f32 1.0, %v556_v26  ;;  %v558_v28 = vpop.f32.mrb[9].mxu1 }
 0x341   : > { %3315 = vst [vmem:[#allocation37_spill] sm:$0xff] %v2462_v23  ;;  %v604_v29 = vsub.f32 1.0, %v558_v28  ;;  %v676_v30 = vmin.f32 %v2460_v22, %v2462_v23 }
 0x342   : > { %v2466_v33 = vmax.f32 %v603_v27, 0.0 }
 0x343   : > { %v2468_v34 = vmax.f32 %v604_v29, 0.0  ;;  %677 = vmin.xlane.f32.xlu1 %v676_v30  ;;  %v562_v35 = vpop.f32.mrb[10].mxu1 }
 0x344   : > { %3316 = vst [vmem:[#allocation38_spill] sm:$0xff] %v2466_v33  ;;  %v605_v36 = vsub.f32 1.0, %v562_v35  ;;  %v564_v37 = vpop.f32.mrb[11].mxu1 }
 0x345   : > { %3317 = vst [vmem:[#allocation39_spill] sm:$0xff] %v2468_v34  ;;  %v606_v40 = vsub.f32 1.0, %v564_v37  ;;  %v679_v41 = vmin.f32 %v2466_v33, %v2468_v34 }
 0x346   : > { %v2472_v42 = vmax.f32 %v605_v36, 0.0 }
 0x347   : > { %v2474_v43 = vmax.f32 %v606_v40, 0.0  ;;  %680 = vmin.xlane.f32.xlu1 %v679_v41  ;;  %v568_v44 = vpop.f32.mrb[12].mxu1 }
 0x348   : > { %3318 = vst [vmem:[#allocation40_spill] sm:$0xff] %v2472_v42  ;;  %v607_v47 = vsub.f32 1.0, %v568_v44  ;;  %v570_v48 = vpop.f32.mrb[13].mxu1 }
 0x349   : > { %3319 = vst [vmem:[#allocation41_spill] sm:$0xff] %v2474_v43  ;;  %v608_v49 = vsub.f32 1.0, %v570_v48  ;;  %v682_v50 = vmin.f32 %v2472_v42, %v2474_v43 }
 0x34a   : > { %v2478_v51 = vmax.f32 %v607_v47, 0.0 }
 0x34b   : > { %v2480_v54 = vmax.f32 %v608_v49, 0.0  ;;  %683 = vmin.xlane.f32.xlu1 %v682_v50  ;;  %v574_v55 = vpop.f32.mrb[14].mxu1 }
 0x34c   : > { %3320 = vst [vmem:[#allocation42_spill] sm:$0xff] %v2478_v51  ;;  %v609_v56 = vsub.f32 1.0, %v574_v55  ;;  %v576_v57 = vpop.f32.mrb[15].mxu1 }
 0x34d   : > { %3321 = vst [vmem:[#allocation43_spill] sm:$0xff] %v2480_v54  ;;  %v610_v58 = vsub.f32 1.0, %v576_v57  ;;  %v685_v61 = vmin.f32 %v2478_v51, %v2480_v54 }
 0x34e   : > { %v2484_v62 = vmax.f32 %v609_v56, 0.0 }
 0x34f   : > { %v2486_v63 = vmax.f32 %v610_v58, 0.0  ;;  %686 = vmin.xlane.f32.xlu1 %v685_v61 }
 0x350   : > { %3322 = vst [vmem:[#allocation44_spill] sm:$0xff] %v2484_v62 }
 0x351   : > { %3323 = vst [vmem:[#allocation45_spill] sm:$0xff] %v2486_v63  ;;  %v688_v0 = vmin.f32 %v2484_v62, %v2486_v63 }
 0x353   : > { %689 = vmin.xlane.f32.xlu1 %v688_v0 }
 0x3a4   : > { %v645_v1 = vpop.xlane.xlu1 %644 }
 0x3a5   : > { %v691_v6 = vadd.f32 1e-05, %v645_v1 }
 0x3a7   : > { %1754 = vrcp.f32 %v691_v6 }
 0x3a8   : > { %v648_v7 = vpop.xlane.xlu1 %647 }
 0x3a9   : > { %v692_v8 = vadd.f32 1e-05, %v648_v7 }
 0x3ab   : > { %1756 = vrcp.f32 %v692_v8 }
 0x3ac   : > { %v651_v9 = vpop.xlane.xlu1 %650 }
 0x3ad   : > { %v693_v12 = vadd.f32 1e-05, %v651_v9 }
 0x3af   : > { %1758 = vrcp.f32 %v693_v12 }
 0x3b0   : > { %v654_v15 = vpop.xlane.xlu1 %653 }
 0x3b1   : > { %v1755_v16 = vpop.eup %1754  ;;  %v694_v19 = vadd.f32 1e-05, %v654_v15 }
 0x3b2   : > { %v708_v20 = vmul.f32 2.0, %v1755_v16 }
 0x3b3   : > { %1760 = vrcp.f32 %v694_v19 }
 0x3b4   : > { %v739_v21 = vmul.f32 %v708_v20, %v2394_v3  ;;  %v740_v26 = vmul.f32 %v708_v20, %v2396_v4  ;;  %v657_v27 = vpop.xlane.xlu1 %656 }
 0x3b5   : > { %v1757_v28 = vpop.eup %1756  ;;  %v695_v29 = vadd.f32 1e-05, %v657_v27 }
 0x3b6   : > { %v771_v30 = vsub.f32 2.0, %v739_v21  ;;  %v772_v35 = vsub.f32 2.0, %v740_v26  ;;  %v710_v36 = vmul.f32 2.0, %v1757_v28 }
 0x3b7   : > { %1762 = vrcp.f32 %v695_v29 }
 0x3b8   : > { %v803_v37 = vmul.f32 1.442695, %v771_v30  ;;  %v805_v40 = vmul.f32 1.442695, %v772_v35  ;;  %v741_v41 = vmul.f32 %v710_v36, %v2400_v10  ;;  %v742_v44 = vmul.f32 %v710_v36, %v2402_v11  ;;  %v660_v47 = vpop.xlane.xlu1 %659 }
 0x3b9   : > { %v1759_v48 = vpop.eup %1758  ;;  %v696_v49 = vadd.f32 1e-05, %v660_v47 }
 0x3ba   : > { %1764 = vpow2.f32 %v803_v37  ;;  %v773_v50 = vsub.f32 2.0, %v741_v41  ;;  %v774_v55 = vsub.f32 2.0, %v742_v44  ;;  %v712_v56 = vmul.f32 2.0, %v1759_v48 }
 0x3bb   : > { %1766 = vpow2.f32 %v805_v40 }
 0x3bc   : > { %v807_v57 = vmul.f32 1.442695, %v773_v50  ;;  %v809_v58 = vmul.f32 1.442695, %v774_v55  ;;  %v743_v61 = vmul.f32 %v712_v56, %v2406_v17  ;;  %v744_v0 = vmul.f32 %v712_v56, %v2408_v18  ;;  %v663_v1 = vpop.xlane.xlu1 %662 }
 0x3bd   : > { %v1761_v6 = vpop.eup %1760  ;;  %1768 = vrcp.f32 %v696_v49  ;;  %v697_v7 = vadd.f32 1e-05, %v663_v1 }
 0x3be   : > { %1770 = vpow2.f32 %v807_v57  ;;  %v775_v8 = vsub.f32 2.0, %v743_v61  ;;  %v776_v9 = vsub.f32 2.0, %v744_v0  ;;  %v714_v12 = vmul.f32 2.0, %v1761_v6 }
 0x3bf   : > { %1772 = vpow2.f32 %v809_v58 }
 0x3c0   : > { %v811_v15 = vmul.f32 1.442695, %v775_v8  ;;  %v813_v16 = vmul.f32 1.442695, %v776_v9  ;;  %v745_v19 = vmul.f32 %v714_v12, %v2412_v24  ;;  %v746_v20 = vmul.f32 %v714_v12, %v2414_v25  ;;  %v666_v21 = vpop.xlane.xlu1 %665 }
 0x3c1   : > { %v1763_v26 = vpop.eup %1762  ;;  %1774 = vrcp.f32 %v697_v7  ;;  %v698_v27 = vadd.f32 1e-05, %v666_v21 }
 0x3c2   : > { %1776 = vpow2.f32 %v811_v15  ;;  %v777_v28 = vsub.f32 2.0, %v745_v19  ;;  %v778_v29 = vsub.f32 2.0, %v746_v20  ;;  %v716_v30 = vmul.f32 2.0, %v1763_v26 }
 0x3c3   : > { %1778 = vpow2.f32 %v813_v16 }
 0x3c4   : > { %v2498_v35 = vpop.eup %1764  ;;  %v815_v36 = vmul.f32 1.442695, %v777_v28  ;;  %v817_v37 = vmul.f32 1.442695, %v778_v29  ;;  %v747_v40 = vmul.f32 %v716_v30, %v2418_v31  ;;  %v748_v41 = vmul.f32 %v716_v30, %v2420_v32  ;;  %v669_v44 = vpop.xlane.xlu1 %668 }
 0x3c5   : > { %v2502_v47 = vpop.eup %1766  ;;  %1780 = vrcp.f32 %v698_v27  ;;  %v699_v48 = vadd.f32 1e-05, %v669_v44 }
 0x3c6   : > { %1782 = vpow2.f32 %v815_v36  ;;  %v779_v49 = vsub.f32 2.0, %v747_v40  ;;  %v780_v50 = vsub.f32 2.0, %v748_v41  ;;  %v867_v55 = vadd.f32 %v2502_v47, %v2498_v35 }
 0x3c7   : > { %v1769_v56 = vpop.eup %1768  ;;  %1784 = vpow2.f32 %v817_v37 }
 0x3c8   : > { %v2506_v57 = vpop.eup %1770  ;;  %v819_v58 = vmul.f32 1.442695, %v779_v49  ;;  %v821_v61 = vmul.f32 1.442695, %v780_v50  ;;  %v718_v0 = vmul.f32 2.0, %v1769_v56  ;;  %1786 = vrcp.f32 %v699_v48  ;;  %868 = vadd.xlane.f32.xlu1 %v867_v55  ;;  %v672_v1 = vpop.xlane.xlu0 %671 }
 0x3c9   : > { %v2508_v6 = vpop.eup %1772  ;;  %v700_v7 = vadd.f32 1e-05, %v672_v1 }
 0x3ca   : > { %1788 = vpow2.f32 %v819_v58  ;;  %v749_v8 = vmul.f32 %v718_v0, %v2424_v38  ;;  %v750_v9 = vmul.f32 %v718_v0, %v2426_v39  ;;  %v870_v12 = vadd.f32 %v2508_v6, %v2506_v57 }
 0x3cb   : > { %v1775_v15 = vpop.eup %1774  ;;  %1790 = vpow2.f32 %v821_v61 }
 0x3cc   : > { %v2514_v16 = vpop.eup %1776  ;;  %v781_v19 = vsub.f32 2.0, %v749_v8  ;;  %v782_v20 = vsub.f32 2.0, %v750_v9  ;;  %v720_v21 = vmul.f32 2.0, %v1775_v15  ;;  %1792 = vrcp.f32 %v700_v7  ;;  %871 = vadd.xlane.f32.xlu1 %v870_v12  ;;  %v675_v26 = vpop.xlane.xlu1 %674 }
 0x3cd   : > { %v2516_v27 = vpop.eup %1778  ;;  %v701_v28 = vadd.f32 1e-05, %v675_v26 }
 0x3ce   : > { %v823_v29 = vmul.f32 1.442695, %v781_v19  ;;  %v825_v30 = vmul.f32 1.442695, %v782_v20  ;;  %v751_v36 = vmul.f32 %v720_v21, %v2430_v45  ;;  %v752_v37 = vmul.f32 %v720_v21, %v2432_v46 }
 0x3cf   : > { %v1781_v40 = vpop.eup %1780  ;;  %1794 = vrcp.f32 %v701_v28  ;;  %v873_v41 = vadd.f32 %v2516_v27, %v2514_v16 }
 0x3d0   : > { %v2522_v44 = vpop.eup %1782  ;;  %1796 = vpow2.f32 %v823_v29  ;;  %v783_v48 = vsub.f32 2.0, %v751_v36  ;;  %v784_v49 = vsub.f32 2.0, %v752_v37  ;;  %v722_v50 = vmul.f32 2.0, %v1781_v40  ;;  %v678_v55 = vpop.xlane.xlu1 %677 }
 0x3d1   : > { %v2524_v56 = vpop.eup %1784  ;;  %1798 = vpow2.f32 %v825_v30  ;;  %874 = vadd.xlane.f32.xlu1 %v873_v41  ;;  %v702_v58 = vadd.f32 1e-05, %v678_v55 }
 0x3d2   : > { %v1787_v61 = vpop.eup %1786  ;;  %v827_v0 = vmul.f32 1.442695, %v783_v48  ;;  %v829_v1 = vmul.f32 1.442695, %v784_v49  ;;  %v753_v7 = vmul.f32 %v722_v50, %v2436_v52  ;;  %v754_v8 = vmul.f32 %v722_v50, %v2438_v53 }
 0x3d3   : > { %v724_v9 = vmul.f32 2.0, %v1787_v61  ;;  %1800 = vrcp.f32 %v702_v58  ;;  %v876_v12 = vadd.f32 %v2524_v56, %v2522_v44 }
 0x3d4   : > { %v2530_v15 = vpop.eup %1788  ;;  %1802 = vpow2.f32 %v827_v0  ;;  %v785_v19 = vsub.f32 2.0, %v753_v7  ;;  %v786_v20 = vsub.f32 2.0, %v754_v8  ;;  %v681_v21 = vpop.xlane.xlu1 %680 }
 0x3d5   : > { %v2532_v26 = vpop.eup %1790  ;;  %1804 = vpow2.f32 %v829_v1  ;;  %v755_v28 = vmul.f32 %v724_v9, %v2442_v59  ;;  %v756_v29 = vmul.f32 %v724_v9, %v2444_v60  ;;  %877 = vadd.xlane.f32.xlu1 %v876_v12  ;;  %v703_v30 = vadd.f32 1e-05, %v681_v21 }
 0x3d6   : > { %v1793_v36 = vpop.eup %1792  ;;  %v831_v37 = vmul.f32 1.442695, %v785_v19  ;;  %v833_v40 = vmul.f32 1.442695, %v786_v20  ;;  %v879_v41 = vadd.f32 %v2532_v26, %v2530_v15 }
 0x3d7   : > { %v787_v48 = vsub.f32 2.0, %v755_v28  ;;  %v788_v49 = vsub.f32 2.0, %v756_v29  ;;  %v726_v50 = vmul.f32 2.0, %v1793_v36  ;;  %1806 = vrcp.f32 %v703_v30 }
 0x3d8   : > { %1808 = vpow2.f32 %v831_v37  ;;  %v684_v55 = vpop.xlane.xlu1 %683 }
 0x3d9   : > { %v1795_v58 = vpop.eup %1794  ;;  %1810 = vpow2.f32 %v833_v40  ;;  %v835_v61 = vmul.f32 1.442695, %v787_v48  ;;  %v837_v0 = vmul.f32 1.442695, %v788_v49  ;;  %v757_v1 = vmul.f32 %v726_v50, %v2448_v2  ;;  %880 = vadd.xlane.f32.xlu1 %v879_v41 }
 0x3da   : > { %v2539_v7 = vpop.eup %1796  ;;  %v758_v8 = vmul.f32 %v726_v50, %v2450_v5  ;;  %v728_v9 = vmul.f32 2.0, %v1795_v58  ;;  %v704_v12 = vadd.f32 1e-05, %v684_v55 }
 0x3db   : > { %v2542_v19 = vpop.eup %1798  ;;  %1812 = vpow2.f32 %v835_v61  ;;  %v789_v20 = vsub.f32 2.0, %v757_v1 }
 0x3dc   : > { %1814 = vpow2.f32 %v837_v0  ;;  %v790_v21 = vsub.f32 2.0, %v758_v8  ;;  %v759_v28 = vmul.f32 %v728_v9, %v2454_v13  ;;  %v760_v29 = vmul.f32 %v728_v9, %v2456_v14  ;;  %v687_v30 = vpop.xlane.xlu1 %686 }
 0x3dd   : > { %v1801_v36 = vpop.eup %1800  ;;  %v839_v37 = vmul.f32 1.442695, %v789_v20  ;;  %1816 = vrcp.f32 %v704_v12  ;;  %v882_v40 = vadd.f32 %v2542_v19, %v2539_v7  ;;  %v705_v41 = vadd.f32 1e-05, %v687_v30 }
 0x3de   : > { %v2548_v48 = vpop.eup %1802  ;;  %v841_v49 = vmul.f32 1.442695, %v790_v21  ;;  %v791_v50 = vsub.f32 2.0, %v759_v28  ;;  %v792_v55 = vsub.f32 2.0, %v760_v29  ;;  %v730_v58 = vmul.f32 2.0, %v1801_v36 }
 0x3df   : > { %v2550_v61 = vpop.eup %1804  ;;  %1818 = vpow2.f32 %v839_v37  ;;  %883 = vadd.xlane.f32.xlu1 %v882_v40 }
 0x3e0   : > { %1820 = vpow2.f32 %v841_v49  ;;  %v843_v0 = vmul.f32 1.442695, %v791_v50  ;;  %v845_v1 = vmul.f32 1.442695, %v792_v55  ;;  %v761_v8 = vmul.f32 %v730_v58, %v2460_v22  ;;  %v690_v9 = vpop.xlane.xlu1 %689 }
 0x3e1   : > { %v1807_v12 = vpop.eup %1806  ;;  %v762_v20 = vmul.f32 %v730_v58, %v2462_v23  ;;  %1822 = vrcp.f32 %v705_v41  ;;  %v885_v21 = vadd.f32 %v2550_v61, %v2548_v48  ;;  %v706_v28 = vadd.f32 1e-05, %v690_v9 }
 0x3e2   : > { %v2556_v29 = vpop.eup %1808  ;;  %1824 = vpow2.f32 %v843_v0  ;;  %v793_v30 = vsub.f32 2.0, %v761_v8  ;;  %v732_v36 = vmul.f32 2.0, %v1807_v12 }
 0x3e3   : > { %v2558_v37 = vpop.eup %1810  ;;  %1826 = vpow2.f32 %v845_v1  ;;  %v794_v40 = vsub.f32 2.0, %v762_v20  ;;  %886 = vadd.xlane.f32.xlu1 %v885_v21 }
 0x3e4   : > { %v847_v49 = vmul.f32 1.442695, %v793_v30  ;;  %v763_v50 = vmul.f32 %v732_v36, %v2466_v33  ;;  %v764_v55 = vmul.f32 %v732_v36, %v2468_v34  ;;  %1828 = vrcp.f32 %v706_v28 }
 0x3e5   : > { %v2562_v41 = vpop.eup %1812  ;;  %v849_v58 = vmul.f32 1.442695, %v794_v40  ;;  %v888_v9 = vadd.f32 %v2558_v37, %v2556_v29 }
 0x3e6   : > { %v2566_v0 = vpop.eup %1814  ;;  %1830 = vpow2.f32 %v847_v49  ;;  %v795_v8 = vsub.f32 2.0, %v763_v50  ;;  %v796_v12 = vsub.f32 2.0, %v764_v55 }
 0x3e7   : > { %v1817_v1 = vpop.eup %1816  ;;  %1832 = vpow2.f32 %v849_v58  ;;  %889 = vadd.xlane.f32.xlu1 %v888_v9  ;;  %v891_v20 = vadd.f32 %v2566_v0, %v2562_v41 }
 0x3e8   : > { %v851_v21 = vmul.f32 1.442695, %v795_v8  ;;  %v853_v30 = vmul.f32 1.442695, %v796_v12  ;;  %v734_v28 = vmul.f32 2.0, %v1817_v1 }
 0x3e9   : > { %v2570_v36 = vpop.eup %1818 }
 0x3ea   : > { %v2572_v40 = vpop.eup %1820  ;;  %1834 = vpow2.f32 %v851_v21  ;;  %v765_v34 = vmul.f32 %v734_v28, %v2472_v42  ;;  %v766_v49 = vmul.f32 %v734_v28, %v2474_v43 }
 0x3eb   : > { %v1823_v50 = vpop.eup %1822  ;;  %1836 = vpow2.f32 %v853_v30  ;;  %892 = vadd.xlane.f32.xlu1 %v891_v20  ;;  %v894_v55 = vadd.f32 %v2572_v40, %v2570_v36 }
 0x3ec   : > { %v2578_v58 = vpop.eup %1824  ;;  %v797_v9 = vsub.f32 2.0, %v765_v34  ;;  %v798_v8 = vsub.f32 2.0, %v766_v49  ;;  %v736_v12 = vmul.f32 2.0, %v1823_v50 }
 0x3ed   : > { %v2580_v1 = vpop.eup %1826 }
 0x3ee   : > { %v1829_v33 = vpop.eup %1828  ;;  %v855_v23 = vmul.f32 1.442695, %v797_v9  ;;  %v857_v21 = vmul.f32 1.442695, %v798_v8  ;;  %v767_v42 = vmul.f32 %v736_v12, %v2478_v51  ;;  %v768_v28 = vmul.f32 %v736_v12, %v2480_v54 }
 0x3ef   : > { %v738_v43 = vmul.f32 2.0, %v1829_v33  ;;  %895 = vadd.xlane.f32.xlu1 %v894_v55  ;;  %v897_v20 = vadd.f32 %v2580_v1, %v2578_v58 }
 0x3f0   : > { %v2586_v30 = vpop.eup %1830  ;;  %1838 = vpow2.f32 %v855_v23  ;;  %v799_v34 = vsub.f32 2.0, %v767_v42  ;;  %v800_v49 = vsub.f32 2.0, %v768_v28 }
 0x3f1   : > { %v2588_v50 = vpop.eup %1832  ;;  %1840 = vpow2.f32 %v857_v21  ;;  %v769_v9 = vmul.f32 %v738_v43, %v2484_v62  ;;  %v770_v8 = vmul.f32 %v738_v43, %v2486_v63 }
 0x3f2   : > { %v859_v51 = vmul.f32 1.442695, %v799_v34  ;;  %v861_v22 = vmul.f32 1.442695, %v800_v49  ;;  %v900_v55 = vadd.f32 %v2588_v50, %v2586_v30 }
 0x3f3   : > { %v801_v12 = vsub.f32 2.0, %v769_v9  ;;  %v802_v33 = vsub.f32 2.0, %v770_v8  ;;  %898 = vadd.xlane.f32.xlu1 %v897_v20 }
 0x3f4   : > { %v2594_v54 = vpop.eup %1834  ;;  %1842 = vpow2.f32 %v859_v51 }
 0x3f5   : > { %v2596_v23 = vpop.eup %1836  ;;  %1844 = vpow2.f32 %v861_v22  ;;  %v863_v42 = vmul.f32 1.442695, %v801_v12  ;;  %v865_v21 = vmul.f32 1.442695, %v802_v33 }
 0x3f6   : > { %v903_v43 = vadd.f32 %v2596_v23, %v2594_v54 }
 0x3f7   : > { %1846 = vpow2.f32 %v863_v42  ;;  %901 = vadd.xlane.f32.xlu1 %v900_v55 }
 0x3f8   : > { %1848 = vpow2.f32 %v865_v21 }
 0x3fa   : > { %v2600_v28 = vpop.eup %1838 }
 0x3fb   : > { %v2602_v20 = vpop.eup %1840  ;;  %904 = vadd.xlane.f32.xlu1 %v903_v43 }
 0x3fc   : > { %v906_v34 = vadd.f32 %v2602_v20, %v2600_v28 }
 0x3fe   : > { %v2606_v51 = vpop.eup %1842 }
 0x3ff   : > { %v2608_v49 = vpop.eup %1844  ;;  %907 = vadd.xlane.f32.xlu1 %v906_v34 }
 0x400   : > { %v909_v22 = vadd.f32 %v2608_v49, %v2606_v51 }
 0x401   : > { %v2612_v9 = vpop.eup %1846 }
 0x402   : > { %v2614_v8 = vpop.eup %1848 }
 0x403   : > { %910 = vadd.xlane.f32.xlu1 %v909_v22  ;;  %v912_v12 = vadd.f32 %v2614_v8, %v2612_v9 }
 0x407   : > { %913 = vadd.xlane.f32.xlu1 %v912_v12 }
 0x455   : > { %v869_v33 = vpop.xlane.xlu1 %868 }
 0x456   : > { %v915_v5 = vadd.f32 1e-05, %v869_v33 }
 0x458   : > { %1850 = vrcp.f32 %v915_v5 }
 0x459   : > { %v872_v55 = vpop.xlane.xlu1 %871 }
 0x45a   : > { %v916_v59 = vadd.f32 1e-05, %v872_v55 }
 0x45e   : > { %v875_v42 = vpop.xlane.xlu1 %874 }
 0x45f   : > { %v917_v60 = vadd.f32 1e-05, %v875_v42 }
 0x461   : > { %1852 = vrcp.f32 %v917_v60 }
 0x462   : > { %v878_v21 = vpop.xlane.xlu1 %877  ;;  %1854 = vrcp.f32 %v916_v59  ;;  %v1851_v60 = vpop.eup %1850 }
 0x463   : > { %v918_v53 = vadd.f32 1e-05, %v878_v21 }
 0x465   : > { %1856 = vrcp.f32 %v918_v53 }
 0x466   : > { %v881_v43 = vpop.xlane.xlu1 %880 }
 0x467   : > { %v919_v22 = vadd.f32 1e-05, %v881_v43 }
 0x469   : > { %1858 = vrcp.f32 %v919_v22 }
 0x46b   : > { %v1853_v59 = vpop.eup %1852 }
 0x46c   : > { %v884_v63 = vpop.xlane.xlu1 %883  ;;  %v1855_v53 = vpop.eup %1854 }
 0x46d   : > { %v920_v12 = vadd.f32 1e-05, %v884_v63  ;;  %v2637_v22 = vmul.f32 %v1855_v53, %v2506_v57 }
 0x46f   : > { %1860 = vrcp.f32 %v920_v12 }
 0x470   : > { %v887_v62 = vpop.xlane.xlu1 %886 }
 0x471   : > { %v921_v46 = vadd.f32 1e-05, %v887_v62 }
 0x473   : > { %1862 = vrcp.f32 %v921_v46  ;;  %v2619_v46 = vmul.f32 %v1853_v59, %v2514_v16 }
 0x474   : > { %v890_v34 = vpop.xlane.xlu1 %889 }
 0x475   : > { %v922_v45 = vadd.f32 1e-05, %v890_v34 }
 0x477   : > { %1864 = vrcp.f32 %v922_v45 }
 0x478   : > { %v893_v14 = vpop.xlane.xlu1 %892 }
 0x479   : > { %v923_v39 = vadd.f32 1e-05, %v893_v14  ;;  %v1857_v14 = vpop.eup %1856 }
 0x47a   : > { %v2634_v43 = vmul.f32 %v1857_v14, %v2524_v56 }
 0x47b   : > { %1866 = vrcp.f32 %v923_v39  ;;  %v2625_v39 = vmul.f32 %v1851_v60, %v2498_v35 }
 0x47c   : > { %v896_v13 = vpop.xlane.xlu1 %895 }
 0x47d   : > { %v924_v32 = vadd.f32 1e-05, %v896_v13  ;;  %v1859_v13 = vpop.eup %1858 }
 0x47e   : > { %v1861_v45 = vpop.eup %1860  ;;  %v2643_v35 = vmul.f32 %v1859_v13, %v2532_v26 }
 0x47f   : > { %1868 = vrcp.f32 %v924_v32  ;;  %v1863_v32 = vpop.eup %1862  ;;  %v2651_v56 = vmul.f32 %v1861_v45, %v2539_v7  ;;  %v2654_v57 = vmul.f32 %v1861_v45, %v2542_v19 }
 0x480   : > { %v899_v2 = vpop.xlane.xlu1 %898  ;;  %v2659_v26 = vmul.f32 %v1863_v32, %v2548_v48 }
 0x481   : > { %v925_v33 = vadd.f32 1e-05, %v899_v2  ;;  %v2631_v2 = vmul.f32 %v1857_v14, %v2522_v44  ;;  %v1865_v34 = vpop.eup %1864  ;;  %v995_v44 = vmax.f32 %v2625_v39, %v2619_v46 }
 0x482   : > { %v2669_v19 = vmul.f32 %v1865_v34, %v2556_v29 }
 0x483   : > { %1870 = vrcp.f32 %v925_v33  ;;  %v2646_v33 = vmul.f32 %v1855_v53, %v2508_v6 }
 0x484   : > { %v902_v52 = vpop.xlane.xlu1 %901 }
 0x485   : > { %v926_v42 = vadd.f32 1e-05, %v902_v52  ;;  %v2628_v52 = vmul.f32 %v1851_v60, %v2502_v47  ;;  %v1867_v47 = vpop.eup %1866  ;;  %v1017_v7 = vmax.f32 %v2646_v33, %v2634_v43 }
 0x486   : > { %v2680_v53 = vmul.f32 %v1867_v47, %v2566_v0 }
 0x487   : > { %1872 = vrcp.f32 %v926_v42  ;;  %v1019_v29 = vmax.f32 %v1017_v7, %v2654_v57 }
 0x488   : > { %v905_v38 = vpop.xlane.xlu1 %904 }
 0x489   : > { %v927_v55 = vadd.f32 1e-05, %v905_v38  ;;  %v2622_v38 = vmul.f32 %v1853_v59, %v2516_v27  ;;  %v2640_v27 = vmul.f32 %v1859_v13, %v2530_v15  ;;  %v1869_v42 = vpop.eup %1868  ;;  %v2677_v59 = vmul.f32 %v1867_v47, %v2562_v41 }
 0x48b   : > { %1874 = vrcp.f32 %v927_v55  ;;  %v1016_v15 = vmax.f32 %v2628_v52, %v2622_v38  ;;  %v2662_v55 = vmul.f32 %v1863_v32, %v2550_v61  ;;  %v997_v48 = vmax.f32 %v995_v44, %v2640_v27 }
 0x48c   : > { %v908_v5 = vpop.xlane.xlu1 %907 }
 0x48d   : > { %v928_v21 = vadd.f32 1e-05, %v908_v5  ;;  %v1871_v6 = vpop.eup %1870  ;;  %v996_v5 = vmax.f32 %v2637_v22, %v2631_v2  ;;  %v1018_v61 = vmax.f32 %v1016_v15, %v2643_v35  ;;  %v999_v45 = vmax.f32 %v997_v48, %v2659_v26 }
 0x48e   : > { %v2693_v32 = vmul.f32 %v1871_v6, %v2578_v58  ;;  %v2696_v0 = vmul.f32 %v1871_v6, %v2580_v1 }
 0x48f   : > { %1876 = vrcp.f32 %v928_v21  ;;  %v2672_v21 = vmul.f32 %v1865_v34, %v2558_v37  ;;  %v998_v14 = vmax.f32 %v996_v5, %v2651_v56  ;;  %v2688_v37 = vmul.f32 %v1869_v42, %v2572_v40 }
 0x490   : > { %v911_v62 = vpop.xlane.xlu1 %910  ;;  %v1020_v41 = vmax.f32 %v1018_v61, %v2662_v55  ;;  %v1001_v47 = vmax.f32 %v999_v45, %v2677_v59 }
 0x491   : > { %v929_v63 = vadd.f32 1e-05, %v911_v62  ;;  %v1873_v60 = vpop.eup %1872  ;;  %v1021_v34 = vmax.f32 %v1019_v29, %v2672_v21 }
 0x492   : > { %v2704_v40 = vmul.f32 %v1873_v60, %v2588_v50  ;;  %v1022_v44 = vmax.f32 %v1020_v41, %v2680_v53  ;;  %v1003_v6 = vmax.f32 %v1001_v47, %v2693_v32 }
 0x493   : > { %1878 = vrcp.f32 %v929_v63  ;;  %v2685_v63 = vmul.f32 %v1869_v42, %v2570_v36  ;;  %v2701_v36 = vmul.f32 %v1873_v60, %v2586_v30  ;;  %v1023_v15 = vmax.f32 %v1021_v34, %v2688_v37 }
 0x494   : > { %v914_v16 = vpop.xlane.xlu1 %913  ;;  %v1024_v5 = vmax.f32 %v1022_v44, %v2696_v0  ;;  %v3252_v34 = vlaneseq  ;;  %v2081_v44 = vmov 1966171168  }
 0x495   : > { %v930_v12 = vadd.f32 1e-05, %v914_v16  ;;  %v1875_v62 = vpop.eup %1874  ;;  %v1000_v16 = vmax.f32 %v998_v14, %v2669_v19  ;;  %v1025_v7 = vmax.f32 %v1023_v15, %v2704_v40 }
 0x496   : > { %v2709_v58 = vmul.f32 %v1875_v62, %v2594_v54  ;;  %v2712_v1 = vmul.f32 %v1875_v62, %v2596_v23 }
 0x497   : > { %1880 = vrcp.f32 %v930_v12  ;;  %v1002_v42 = vmax.f32 %v1000_v16, %v2685_v63 }
 0x499   : > { %v1877_v13 = vpop.eup %1876  ;;  %v1004_v54 = vmax.f32 %v1002_v42, %v2701_v36  ;;  %v1322_v42 = vunpack.c.l.s4 %v2081_v44 }
 0x49a   : > { %v2717_v30 = vmul.f32 %v1877_v13, %v2600_v28  ;;  %v2720_v50 = vmul.f32 %v1877_v13, %v2602_v20  ;;  %v1005_v28 = vmax.f32 %v1003_v6, %v2709_v58  ;;  %v1026_v20 = vmax.f32 %v1024_v5, %v2712_v1 }
 0x49c   : > { %v1006_v61 = vmax.f32 %v1004_v54, %v2717_v30  ;;  %v1027_v62 = vmax.f32 %v1025_v7, %v2720_v50 }
 0x49d   : > { %v1879_v12 = vpop.eup %1878 }
 0x49e   : > { %v2727_v23 = vmul.f32 %v1879_v12, %v2606_v51  ;;  %v2730_v60 = vmul.f32 %v1879_v12, %v2608_v49 }
 0x4a0   : > { %v1007_v51 = vmax.f32 %v1005_v28, %v2727_v23  ;;  %v1028_v49 = vmax.f32 %v1026_v20, %v2730_v60 }
 0x4a1   : > { %v1881_v48 = vpop.eup %1880 }
 0x4a2   : > { %v2737_v14 = vmul.f32 %v1881_v48, %v2612_v9  ;;  %v2740_v29 = vmul.f32 %v1881_v48, %v2614_v8  ;;  %v2747_v8 = vshrl.u32 %v3252_v34, 7  ;;  %v1323_v48 = vunpack.c.0.s8 %v1322_v42 }
 0x4a4   : > { %v1008_v13 = vmax.f32 %v1006_v61, %v2737_v14  ;;  %v1029_v45 = vmax.f32 %v1027_v62, %v2740_v29  ;;  %v2750_v54 = vadd.s32 8, %v2747_v8  ;;  %v2753_v7 = vadd.s32 16, %v2747_v8 }
 0x4a5   : > { %v2756_v28 = vadd.s32 24, %v2747_v8  ;;  %v2759_v20 = vadd.s32 32, %v2747_v8  ;;  %v2780_v42 = vadd.s32 72, %v2747_v8  ;;  %v2795_v34 = vadd.s32 112, %v2747_v8 }
 0x4a6   : > { %v1009_v41 = vmax.f32 %v1007_v51, %v1008_v13  ;;  %v1030_v16 = vmax.f32 %v1028_v49, %v1029_v45  ;;  %v2762_v51 = vadd.s32 40, %v2747_v8  ;;  %v2765_v49 = vadd.s32 48, %v2747_v8 }
 0x4a7   : > { %v2768_v13 = vsub.s32 0, %v2747_v8  ;;  %v2771_v45 = vsub.s32 1, %v2747_v8  ;;  %3328 = vst [vmem:[#allocation50_spill] sm:$0xff] %v2795_v34  ;;  %v2802_v24 = vadd.s32 120, %v2747_v8  ;;  %v2811_v11 = vsub.s32 %v1323_v48, %v2747_v8 }
 0x4a8   : > { %v1010_v12 = vrot.slane %v1009_v41, 4  ;;  %v1031_v47 = vrot.slane %v1030_v16, 4 }
 0x4a9   : > { %3324 = vst [vmem:[#allocation46_spill] sm:$0xff] %v2768_v13  ;;  %3325 = vst [vmem:[#allocation47_spill] sm:$0xff] %v2771_v45 }
 0x4aa   : > { %v1011_v9 = vmax.f32 %v1009_v41, %v1010_v12  ;;  %v1032_v15 = vmax.f32 %v1030_v16, %v1031_v47  ;;  %v2774_v41 = vadd.s32 56, %v2747_v8  ;;  %v2777_v16 = vadd.s32 64, %v2747_v8  ;;  %v1302_v12 = vld [vmem:[#allocation3] sm:$0x3]  ;;  %3329 = vst [vmem:[#allocation51_spill] sm:$0xff] %v2802_v24 }
 0x4ab   : > { %v2805_v18 = vrot.slane %v1302_v12, %v2768_v13  ;;  %v2808_v17 = vrot.slane %v1302_v12, %v2771_v45 }
 0x4ac   : > { %v1012_v6 = vrot.slane %v1011_v9, 2  ;;  %v1033_v5 = vrot.slane %v1032_v15, 2 }
 0x4ae   : > { %v1013_v61 = vmax.f32 %v1011_v9, %v1012_v6  ;;  %v1034_v62 = vmax.f32 %v1032_v15, %v1033_v5  ;;  %v2783_v9 = vadd.s32 80, %v2747_v8  ;;  %v2786_v15 = vadd.s32 88, %v2747_v8 }
 0x4af   : > { %v2789_v6 = vadd.s32 96, %v2747_v8  ;;  %v2792_v5 = vadd.s32 104, %v2747_v8 }
 0x4b0   : > { %v1014_v47 = vrot.slane %v1013_v61, 1  ;;  %v1035_v44 = vrot.slane %v1034_v62, 1 }
 0x4b1   : > { %3326 = vst [vmem:[#allocation48_spill] sm:$0xff] %v2789_v6  ;;  %3327 = vst [vmem:[#allocation49_spill] sm:$0xff] %v2792_v5 }
 0x4b2   : > { %v2797_v31 = vmax.f32 %v1013_v61, %v1014_v47  ;;  %v2799_v25 = vmax.f32 %v1034_v62, %v1035_v44 }
 0x4b4   : > { %vm1054_vm2 = vcmp.eq.f32.partialorder %v2625_v39, %v2797_v31  ;;  %vm1055_vm3 = vcmp.eq.f32.partialorder %v2628_v52, %v2799_v25  ;;  %vm1056_vm4 = vcmp.eq.f32.partialorder %v2637_v22, %v2797_v31  ;;  %vm1057_vm5 = vcmp.eq.f32.partialorder %v2646_v33, %v2799_v25 }
 0x4b5   : > { %vm1058_vm6 = vcmp.eq.f32.partialorder %v2619_v46, %v2797_v31  ;;  %vm1059_vm7 = vcmp.eq.f32.partialorder %v2622_v38, %v2799_v25  ;;  %vm1060_vm8 = vcmp.eq.f32.partialorder %v2631_v2, %v2797_v31  ;;  %vm1061_vm9 = vcmp.eq.f32.partialorder %v2634_v43, %v2799_v25 }
 0x4b6   : > { %vm1062_vm10 = vcmp.eq.f32.partialorder %v2640_v27, %v2797_v31  ;;  %vm1079_vm13 = vcmp.eq.f32.partialorder %v2712_v1, %v2799_v25  ;;  %vm1080_vm14 = vcmp.eq.f32.partialorder %v2717_v30, %v2797_v31  ;;  %vm1081_vm15 = vcmp.eq.f32.partialorder %v2720_v50, %v2799_v25 }
 0x4b7   : > { %vm1082_vm0 = vcmp.eq.f32.partialorder %v2727_v23, %v2797_v31  ;;  %vm1083_vm1 = vcmp.eq.f32.partialorder %v2730_v60, %v2799_v25  ;;  %vm1084_vm11 = vcmp.eq.f32.partialorder %v2737_v14, %v2797_v31  ;;  %vm1085_vm12 = vcmp.eq.f32.partialorder %v2740_v29, %v2799_v25 }
 0x4b8   : > { %v1086_v48 = vsel %vm1054_vm2, %v2747_v8, 128  ;;  %v1087_v61 = vsel %vm1055_vm3, %v2747_v8, 128  ;;  %v1088_v62 = vsel %vm1056_vm4, %v2750_v54, 128  ;;  %v1089_v12 = vsel %vm1057_vm5, %v2750_v54, 128 }
 0x4b9   : > { %v1090_v39 = vsel %vm1058_vm6, %v2753_v7, 128  ;;  %v1091_v52 = vsel %vm1059_vm7, %v2753_v7, 128  ;;  %v1092_v22 = vsel %vm1060_vm8, %v2756_v28, 128  ;;  %v1093_v33 = vsel %vm1061_vm9, %v2756_v28, 128 }
 0x4ba   : > { %v1094_v46 = vsel %vm1062_vm10, %v2759_v20, 128  ;;  %vm3330_vm2 = vcmp.eq.f32.partialorder %v2643_v35, %v2799_v25  ;;  %vm3331_vm3 = vcmp.eq.f32.partialorder %v2651_v56, %v2797_v31  ;;  %vm3332_vm4 = vcmp.eq.f32.partialorder %v2654_v57, %v2799_v25 }
 0x4bb   : > { %v1095_v38 = vsel %vm3330_vm2, %v2759_v20, 128  ;;  %v1096_v2 = vsel %vm3331_vm3, %v2762_v51, 128  ;;  %v1097_v43 = vsel %vm3332_vm4, %v2762_v51, 128  ;;  %vm3333_vm5 = vcmp.eq.f32.partialorder %v2659_v26, %v2797_v31 }
 0x4bc   : > { %v1098_v27 = vsel %vm3333_vm5, %v2765_v49, 128  ;;  %vm3334_vm6 = vcmp.eq.f32.partialorder %v2662_v55, %v2799_v25  ;;  %vm3335_vm7 = vcmp.eq.f32.partialorder %v2669_v19, %v2797_v31  ;;  %vm3336_vm8 = vcmp.eq.f32.partialorder %v2672_v21, %v2799_v25 }
 0x4bd   : > { %v1099_v35 = vsel %vm3334_vm6, %v2765_v49, 128  ;;  %v1100_v56 = vsel %vm3335_vm7, %v2774_v41, 128  ;;  %v1101_v57 = vsel %vm3336_vm8, %v2774_v41, 128  ;;  %vm3337_vm9 = vcmp.eq.f32.partialorder %v2677_v59, %v2797_v31 }
 0x4be   : > { %v1102_v26 = vsel %vm3337_vm9, %v2777_v16, 128  ;;  %vm3338_vm10 = vcmp.eq.f32.partialorder %v2680_v53, %v2799_v25  ;;  %vm3339_vm2 = vcmp.eq.f32.partialorder %v2685_v63, %v2797_v31  ;;  %vm3340_vm3 = vcmp.eq.f32.partialorder %v2688_v37, %v2799_v25 }
 0x4bf   : > { %v1103_v55 = vsel %vm3338_vm10, %v2777_v16, 128  ;;  %v1104_v19 = vsel %vm3339_vm2, %v2780_v42, 128  ;;  %v1105_v21 = vsel %vm3340_vm3, %v2780_v42, 128  ;;  %vm3341_vm4 = vcmp.eq.f32.partialorder %v2693_v32, %v2797_v31 }
 0x4c0   : > { %v1106_v59 = vsel %vm3341_vm4, %v2783_v9, 128  ;;  %vm3342_vm5 = vcmp.eq.f32.partialorder %v2696_v0, %v2799_v25  ;;  %vm3343_vm6 = vcmp.eq.f32.partialorder %v2701_v36, %v2797_v31  ;;  %vm3344_vm7 = vcmp.eq.f32.partialorder %v2704_v40, %v2799_v25 }
 0x4c1   : > { %v1107_v53 = vsel %vm3342_vm5, %v2783_v9, 128  ;;  %v1108_v63 = vsel %vm3343_vm6, %v2786_v15, 128  ;;  %v1109_v37 = vsel %vm3344_vm7, %v2786_v15, 128  ;;  %vm3345_vm8 = vcmp.eq.f32.partialorder %v2709_v58, %v2797_v31 }
 0x4c2   : > { %v1110_v32 = vsel %vm3345_vm8, %v2789_v6, 128  ;;  %v1111_v0 = vsel %vm1079_vm13, %v2789_v6, 128  ;;  %v1112_v36 = vsel %vm1080_vm14, %v2792_v5, 128  ;;  %v1113_v40 = vsel %vm1081_vm15, %v2792_v5, 128 }
 0x4c3   : > { %v1114_v58 = vsel %vm1082_vm0, %v2795_v34, 128  ;;  %v1115_v1 = vsel %vm1083_vm1, %v2795_v34, 128  ;;  %v1116_v30 = vsel %vm1084_vm11, %v2802_v24, 128  ;;  %v1117_v50 = vsel %vm1085_vm12, %v2802_v24, 128 }
 0x4c4   : > { %vm1118_vm13 = vcmp.lt.s32.totalorder %v1086_v48, %v1090_v39  ;;  %vm1120_vm14 = vcmp.lt.s32.totalorder %v1088_v62, %v1092_v22  ;;  %vm1157_vm15 = vcmp.lt.s32.totalorder %v1087_v61, %v1091_v52  ;;  %vm1159_vm9 = vcmp.lt.s32.totalorder %v1089_v12, %v1093_v33 }
 0x4c5   : > { %v1119_v23 = vsel %vm1118_vm13, %v1086_v48, %v1090_v39  ;;  %v1121_v47 = vsel %vm1120_vm14, %v1088_v62, %v1092_v22  ;;  %v1158_v44 = vsel %vm1157_vm15, %v1087_v61, %v1091_v52  ;;  %v1160_v45 = vsel %vm1159_vm9, %v1089_v12, %v1093_v33 }
 0x4c6   : > { %vm1122_vm0 = vcmp.lt.s32.totalorder %v1119_v23, %v1094_v46  ;;  %vm1124_vm1 = vcmp.lt.s32.totalorder %v1121_v47, %v1096_v2  ;;  %vm1161_vm10 = vcmp.lt.s32.totalorder %v1158_v44, %v1095_v38  ;;  %vm1163_vm2 = vcmp.lt.s32.totalorder %v1160_v45, %v1097_v43 }
 0x4c7   : > { %v1123_v60 = vsel %vm1122_vm0, %v1119_v23, %v1094_v46  ;;  %v1125_v14 = vsel %vm1124_vm1, %v1121_v47, %v1096_v2  ;;  %v1162_v13 = vsel %vm1161_vm10, %v1158_v44, %v1095_v38  ;;  %v1164_v34 = vsel %vm1163_vm2, %v1160_v45, %v1097_v43  ;;  %v3349_v44 = vld [vmem:[#allocation17_spill] sm:$0xff] }
 0x4c8   : > { %vm1126_vm11 = vcmp.lt.s32.totalorder %v1123_v60, %v1098_v27  ;;  %vm1128_vm3 = vcmp.lt.s32.totalorder %v1125_v14, %v1100_v56  ;;  %vm1165_vm4 = vcmp.lt.s32.totalorder %v1162_v13, %v1099_v35  ;;  %vm1167_vm12 = vcmp.lt.s32.totalorder %v1164_v34, %v1101_v57 }
 0x4c9   : > { %v1127_v29 = vsel %vm1126_vm11, %v1123_v60, %v1098_v27  ;;  %v1129_v24 = vsel %vm1128_vm3, %v1125_v14, %v1100_v56  ;;  %v1166_v5 = vsel %vm1165_vm4, %v1162_v13, %v1099_v35  ;;  %v1168_v6 = vsel %vm1167_vm12, %v1164_v34, %v1101_v57  ;;  %v3351_v14 = vld [vmem:[#allocation19_spill] sm:$0xff] }
 0x4ca   : > { %vm1130_vm5 = vcmp.lt.s32.totalorder %v1127_v29, %v1102_v26  ;;  %vm1132_vm6 = vcmp.lt.s32.totalorder %v1129_v24, %v1104_v19  ;;  %vm1169_vm7 = vcmp.lt.s32.totalorder %v1166_v5, %v1103_v55  ;;  %vm1171_vm8 = vcmp.lt.s32.totalorder %v1168_v6, %v1105_v21 }
 0x4cb   : > { %v1131_v48 = vsel %vm1130_vm5, %v1127_v29, %v1102_v26  ;;  %v1133_v61 = vsel %vm1132_vm6, %v1129_v24, %v1104_v19  ;;  %v1170_v62 = vsel %vm1169_vm7, %v1166_v5, %v1103_v55  ;;  %v1172_v12 = vsel %vm1171_vm8, %v1168_v6, %v1105_v21 }
 0x4cc   : > { %vm1134_vm13 = vcmp.lt.s32.totalorder %v1131_v48, %v1106_v59  ;;  %vm1136_vm14 = vcmp.lt.s32.totalorder %v1133_v61, %v1108_v63  ;;  %vm1173_vm15 = vcmp.lt.s32.totalorder %v1170_v62, %v1107_v53  ;;  %vm1175_vm9 = vcmp.lt.s32.totalorder %v1172_v12, %v1109_v37 }
 0x4cd   : > { %v1135_v45 = vsel %vm1134_vm13, %v1131_v48, %v1106_v59  ;;  %v1137_v39 = vsel %vm1136_vm14, %v1133_v61, %v1108_v63  ;;  %v1174_v52 = vsel %vm1173_vm15, %v1170_v62, %v1107_v53  ;;  %v1176_v22 = vsel %vm1175_vm9, %v1172_v12, %v1109_v37  ;;  %v3352_v48 = vld [vmem:[#allocation20_spill] sm:$0xff]  ;;  %v3353_v62 = vld [vmem:[#allocation21_spill] sm:$0xff] }
 0x4ce   : > { %vm1138_vm0 = vcmp.lt.s32.totalorder %v1135_v45, %v1110_v32  ;;  %vm1140_vm1 = vcmp.lt.s32.totalorder %v1137_v39, %v1112_v36  ;;  %vm1177_vm10 = vcmp.lt.s32.totalorder %v1174_v52, %v1111_v0  ;;  %vm1179_vm2 = vcmp.lt.s32.totalorder %v1176_v22, %v1113_v40 }
 0x4cf   : > { %v1139_v34 = vsel %vm1138_vm0, %v1135_v45, %v1110_v32  ;;  %v1141_v13 = vsel %vm1140_vm1, %v1137_v39, %v1112_v36  ;;  %v1178_v33 = vsel %vm1177_vm10, %v1174_v52, %v1111_v0  ;;  %v1180_v46 = vsel %vm1179_vm2, %v1176_v22, %v1113_v40  ;;  %v3354_v39 = vld [vmem:[#allocation22_spill] sm:$0xff]  ;;  %v3355_v22 = vld [vmem:[#allocation23_spill] sm:$0xff] }
 0x4d0   : > { %vm1142_vm11 = vcmp.lt.s32.totalorder %v1139_v34, %v1114_v58  ;;  %vm1144_vm3 = vcmp.lt.s32.totalorder %v1141_v13, %v1116_v30  ;;  %vm1181_vm4 = vcmp.lt.s32.totalorder %v1178_v33, %v1115_v1  ;;  %vm1183_vm12 = vcmp.lt.s32.totalorder %v1180_v46, %v1117_v50 }
 0x4d1   : > { %v1143_v24 = vsel %vm1142_vm11, %v1139_v34, %v1114_v58  ;;  %v1145_v6 = vsel %vm1144_vm3, %v1141_v13, %v1116_v30  ;;  %v1182_v5 = vsel %vm1181_vm4, %v1178_v33, %v1115_v1  ;;  %v1184_v38 = vsel %vm1183_vm12, %v1180_v46, %v1117_v50  ;;  %v3356_v33 = vld [vmem:[#allocation24_spill] sm:$0xff] }
 0x4d2   : > { %vm1146_vm5 = vcmp.lt.s32.totalorder %v1143_v24, %v1145_v6  ;;  %vm1185_vm6 = vcmp.lt.s32.totalorder %v1182_v5, %v1184_v38  ;;  %vm1314_vm7 = vcmp.gt.f32.partialorder %v2797_v31, %v2805_v18  ;;  %vm1315_vm8 = vcmp.gt.f32.partialorder %v2799_v25, %v2808_v17 }
 0x4d3   : > { %v1147_v2 = vsel %vm1146_vm5, %v1143_v24, %v1145_v6  ;;  %v1186_v43 = vsel %vm1185_vm6, %v1182_v5, %v1184_v38  ;;  %v1316_v27 = vsel %vm1314_vm7, %v2797_v31, %v2805_v18  ;;  %v1317_v35 = vsel %vm1315_vm8, %v2799_v25, %v2808_v17  ;;  %v3357_v24 = vld [vmem:[#allocation25_spill] sm:$0xff]  ;;  %v3358_v38 = vld [vmem:[#allocation26_spill] sm:$0xff] }
 0x4d4   : > { %v1148_v56 = vrot.slane %v1147_v2, 4  ;;  %v1187_v57 = vrot.slane %v1186_v43, 4  ;;  %v1320_v26 = vcombine.low %v1316_v27, %v1317_v35  ;;  %v3346_v19 = vlaneseq }
 0x4d6   : > { %vm1149_vm13 = vcmp.lt.s32.totalorder %v1147_v2, %v1148_v56  ;;  %vm1188_vm14 = vcmp.lt.s32.totalorder %v1186_v43, %v1187_v57  ;;  %v1327_v55 = vrot.slane %v1320_v26, %v2811_v11  ;;  %vm3021_vm15 = vcmp.lt.s32.totalorder %v3346_v19, 256  ;;  %v3361_v26 = vld [vmem:[#allocation29_spill] sm:$0xff] }
 0x4d7   : > { %v1150_v59 = vsel %vm1149_vm13, %v1147_v2, %v1148_v56  ;;  %v1189_v53 = vsel %vm1188_vm14, %v1186_v43, %v1187_v57  ;;  %v3359_v43 = vld [vmem:[#allocation27_spill] sm:$0xff]  ;;  %v3360_v56 = vld [vmem:[#allocation28_spill] sm:$0xff] }
 0x4d8   : > { %v1151_v63 = vrot.slane %v1150_v59, 2  ;;  %v1190_v37 = vrot.slane %v1189_v53, 2  ;;  %v1334_v32 = vrot.slane %v1327_v55, %v2811_v11 }
 0x4da   : > { %vm1152_vm9 = vcmp.lt.s32.totalorder %v1150_v59, %v1151_v63  ;;  %vm1191_vm0 = vcmp.lt.s32.totalorder %v1189_v53, %v1190_v37  ;;  %1340 = vst.msk [vmem:[#allocation3] sm:$0x3] %vm3021_vm15, %v1334_v32 }
 0x4db   : > { %v1153_v0 = vsel %vm1152_vm9, %v1150_v59, %v1151_v63  ;;  %v1192_v36 = vsel %vm1191_vm0, %v1189_v53, %v1190_v37  ;;  %v3362_v59 = vld [vmem:[#allocation30_spill] sm:$0xff]  ;;  %v3363_v63 = vld [vmem:[#allocation31_spill] sm:$0xff] }
 0x4dc   : > { %v1154_v40 = vrot.slane %v1153_v0, 1  ;;  %v1193_v58 = vrot.slane %v1192_v36, 1 }
 0x4de   : > { %vm1155_vm1 = vcmp.lt.s32.totalorder %v1153_v0, %v1154_v40  ;;  %vm1194_vm10 = vcmp.lt.s32.totalorder %v1192_v36, %v1193_v58 }
 0x4df   : > { %v3028_v1 = vsel %vm1155_vm1, %v1153_v0, %v1154_v40  ;;  %v3030_v30 = vsel %vm1194_vm10, %v1192_v36, %v1193_v58  ;;  %v3364_v0 = vld [vmem:[#allocation32_spill] sm:$0xff]  ;;  %v3365_v40 = vld [vmem:[#allocation33_spill] sm:$0xff] }
 0x4e0   : > { %vm1196_vm2 = vcmp.eq.s32.totalorder %v2747_v8, %v3028_v1  ;;  %vm1197_vm11 = vcmp.eq.s32.totalorder %v2747_v8, %v3030_v30  ;;  %vm1198_vm3 = vcmp.eq.s32.totalorder %v2750_v54, %v3028_v1  ;;  %vm1199_vm4 = vcmp.eq.s32.totalorder %v2750_v54, %v3030_v30  ;;  %v3350_v54 = vld [vmem:[#allocation18_spill] sm:$0xff] }
 0x4e1   : > { %v1228_v50 = vsel %vm1196_vm2, %v2394_v3, 0.0  ;;  %v1229_v23 = vsel %vm1197_vm11, %v2396_v4, 0.0  ;;  %v1230_v47 = vsel %vm1198_vm3, %v2400_v10, 0.0  ;;  %v1231_v60 = vsel %vm1199_vm4, %v3349_v44, 0.0  ;;  %v3367_v44 = vld [vmem:[#allocation35_spill] sm:$0xff] }
 0x4e2   : > { %vm1200_vm12 = vcmp.eq.s32.totalorder %v2753_v7, %v3028_v1  ;;  %vm1201_vm5 = vcmp.eq.s32.totalorder %v2753_v7, %v3030_v30  ;;  %vm1202_vm6 = vcmp.eq.s32.totalorder %v2756_v28, %v3028_v1  ;;  %vm1203_vm13 = vcmp.eq.s32.totalorder %v2756_v28, %v3030_v30 }
 0x4e3   : > { %v1260_v8 = vadd.f32 %v1230_v47, %v1228_v50  ;;  %v1281_v3 = vadd.f32 %v1231_v60, %v1229_v23  ;;  %v1232_v4 = vsel %vm1200_vm12, %v3350_v54, 0.0  ;;  %v1233_v10 = vsel %vm1201_vm5, %v3351_v14, 0.0  ;;  %v3366_v23 = vld [vmem:[#allocation34_spill] sm:$0xff]  ;;  %v3369_v54 = vld [vmem:[#allocation36_spill] sm:$0xff]  ;;  %v3370_v14 = vld [vmem:[#allocation37_spill] sm:$0xff] }
 0x4e4   : > { %vm1204_vm14 = vcmp.eq.s32.totalorder %v2759_v20, %v3028_v1  ;;  %vm1205_vm9 = vcmp.eq.s32.totalorder %v2759_v20, %v3030_v30  ;;  %v1234_v61 = vsel %vm1202_vm6, %v3352_v48, 0.0  ;;  %v1235_v12 = vsel %vm1203_vm13, %v3353_v62, 0.0  ;;  %v3372_v48 = vld [vmem:[#allocation38_spill] sm:$0xff]  ;;  %v3373_v62 = vld [vmem:[#allocation39_spill] sm:$0xff] }
 0x4e5   : > { %v1261_v29 = vadd.f32 %v1260_v8, %v1232_v4  ;;  %v1282_v7 = vadd.f32 %v1281_v3, %v1233_v10  ;;  %vm1206_vm0 = vcmp.eq.s32.totalorder %v2762_v51, %v3028_v1  ;;  %vm1207_vm1 = vcmp.eq.s32.totalorder %v2762_v51, %v3030_v30 }
 0x4e6   : > { %v1236_v52 = vsel %vm1204_vm14, %v3354_v39, 0.0  ;;  %v1237_v34 = vsel %vm1205_vm9, %v3355_v22, 0.0  ;;  %vm1208_vm10 = vcmp.eq.s32.totalorder %v2765_v49, %v3028_v1  ;;  %vm1209_vm2 = vcmp.eq.s32.totalorder %v2765_v49, %v3030_v30 }
 0x4e7   : > { %v1262_v28 = vadd.f32 %v1261_v29, %v1234_v61  ;;  %v1283_v45 = vadd.f32 %v1282_v7, %v1235_v12  ;;  %v1238_v46 = vsel %vm1206_vm0, %v3356_v33, 0.0  ;;  %v1239_v6 = vsel %vm1207_vm1, %v3357_v24, 0.0  ;;  %v3378_v24 = vld [vmem:[#allocation42_spill] sm:$0xff] }
 0x4e8   : > { %vm1210_vm11 = vcmp.eq.s32.totalorder %v2774_v41, %v3028_v1  ;;  %vm1211_vm3 = vcmp.eq.s32.totalorder %v2774_v41, %v3030_v30  ;;  %v1240_v2 = vsel %vm1208_vm10, %v3358_v38, 0.0  ;;  %v1241_v27 = vsel %vm1209_vm2, %v3359_v43, 0.0  ;;  %v3380_v43 = vld [vmem:[#allocation44_spill] sm:$0xff] }
 0x4e9   : > { %v1263_v20 = vadd.f32 %v1262_v28, %v1236_v52  ;;  %v1284_v13 = vadd.f32 %v1283_v45, %v1237_v34  ;;  %vm1212_vm4 = vcmp.eq.s32.totalorder %v2777_v16, %v3028_v1  ;;  %vm1213_vm12 = vcmp.eq.s32.totalorder %v2777_v16, %v3030_v30  ;;  %v3374_v28 = vld [vmem:[#allocation50_spill] sm:$0xff]  ;;  %v3375_v52 = vld [vmem:[#allocation40_spill] sm:$0xff]  ;;  %v3376_v34 = vld [vmem:[#allocation41_spill] sm:$0xff] }
 0x4ea   : > { %v1242_v57 = vsel %vm1210_vm11, %v3360_v56, 0.0  ;;  %v1243_v55 = vsel %vm1211_vm3, %v3361_v26, 0.0  ;;  %vm1214_vm5 = vcmp.eq.s32.totalorder %v2780_v42, %v3028_v1  ;;  %vm1215_vm6 = vcmp.eq.s32.totalorder %v2780_v42, %v3030_v30 }
 0x4eb   : > { %v1264_v51 = vadd.f32 %v1263_v20, %v1238_v46  ;;  %v1285_v5 = vadd.f32 %v1284_v13, %v1239_v6  ;;  %v1244_v53 = vsel %vm1212_vm4, %v3362_v59, 0.0  ;;  %v1245_v37 = vsel %vm1213_vm12, %v3363_v63, 0.0  ;;  %v3377_v13 = vld [vmem:[#allocation51_spill] sm:$0xff]  ;;  %v1341_v59 = vld [vmem:[#allocation4] sm:$0x3] }
 0x4ec   : > { %vm1216_vm13 = vcmp.eq.s32.totalorder %v2783_v9, %v3028_v1  ;;  %vm1217_vm14 = vcmp.eq.s32.totalorder %v2783_v9, %v3030_v30  ;;  %v1246_v36 = vsel %vm1214_vm5, %v3364_v0, 0.0  ;;  %v1247_v58 = vsel %vm1215_vm6, %v3365_v40, 0.0  ;;  %v3368_v9 = vld [vmem:[#allocation48_spill] sm:$0xff] }
 0x4ed   : > { %v1265_v49 = vadd.f32 %v1264_v51, %v1240_v2  ;;  %v1286_v35 = vadd.f32 %v1285_v5, %v1241_v27  ;;  %vm1218_vm9 = vcmp.eq.s32.totalorder %v2786_v15, %v3028_v1  ;;  %vm1219_vm0 = vcmp.eq.s32.totalorder %v2786_v15, %v3030_v30  ;;  %v3371_v15 = vld [vmem:[#allocation49_spill] sm:$0xff]  ;;  %v3379_v51 = vld [vmem:[#allocation43_spill] sm:$0xff] }
 0x4ee   : > { %v1248_v47 = vsel %vm1216_vm13, %v3366_v23, 0.0  ;;  %v1249_v60 = vsel %vm1217_vm14, %v3367_v44, 0.0  ;;  %vm1220_vm1 = vcmp.eq.s32.totalorder %v3368_v9, %v3028_v1  ;;  %vm1221_vm10 = vcmp.eq.s32.totalorder %v3368_v9, %v3030_v30 }
 0x4ef   : > { %v1266_v41 = vadd.f32 %v1265_v49, %v1242_v57  ;;  %v1287_v19 = vadd.f32 %v1286_v35, %v1243_v55  ;;  %v1250_v4 = vsel %vm1218_vm9, %v3369_v54, 0.0  ;;  %v1251_v10 = vsel %vm1219_vm0, %v3370_v14, 0.0  ;;  %v3381_v49 = vld [vmem:[#allocation45_spill] sm:$0xff]  ;;  %v3385_v54 = vld [vmem:[#allocation46_spill] sm:$0xff] (!%p1617_p7) }
 0x4f0   : > { %vm1222_vm2 = vcmp.eq.s32.totalorder %v3371_v15, %v3028_v1  ;;  %vm1223_vm11 = vcmp.eq.s32.totalorder %v3371_v15, %v3030_v30  ;;  %v1252_v61 = vsel %vm1220_vm1, %v3372_v48, 0.0  ;;  %v1253_v12 = vsel %vm1221_vm10, %v3373_v62, 0.0 }
 0x4f1   : > { %v1267_v16 = vadd.f32 %v1266_v41, %v1244_v53  ;;  %v1288_v32 = vadd.f32 %v1287_v19, %v1245_v37  ;;  %vm1224_vm3 = vcmp.eq.s32.totalorder %v3374_v28, %v3028_v1  ;;  %vm1225_vm4 = vcmp.eq.s32.totalorder %v3374_v28, %v3030_v30  ;;  %v3382_v37 = vld [vmem:[#allocation46_spill] sm:$0xff] }
 0x4f2   : > { %v1254_v22 = vsel %vm1222_vm2, %v3375_v52, 0.0  ;;  %v1255_v20 = vsel %vm1223_vm11, %v3376_v34, 0.0  ;;  %vm1226_vm12 = vcmp.eq.s32.totalorder %v3377_v13, %v3028_v1  ;;  %vm1227_vm5 = vcmp.eq.s32.totalorder %v3377_v13, %v3030_v30 }
 0x4f3   : > { %v1268_v42 = vadd.f32 %v1267_v16, %v1246_v36  ;;  %v1289_v50 = vadd.f32 %v1288_v32, %v1247_v58  ;;  %v1256_v6 = vsel %vm1224_vm3, %v3378_v24, 0.0  ;;  %v1257_v5 = vsel %vm1225_vm4, %v3379_v51, 0.0  ;;  %v3383_v32 = vld [vmem:[#allocation47_spill] sm:$0xff] }
 0x4f4   : > { %v1258_v27 = vsel %vm1226_vm12, %v3380_v43, 0.0  ;;  %v1259_v35 = vsel %vm1227_vm5, %v3381_v49, 0.0  ;;  %v1346_v16 = vrot.slane %v1341_v59, %v3382_v37  ;;  %v1350_v0 = vrot.slane %v1341_v59, %v3383_v32 }
 0x4f5   : > { %v1269_v8 = vadd.f32 %v1268_v42, %v1248_v47  ;;  %v1290_v3 = vadd.f32 %v1289_v50, %v1249_v60 }
 0x4f7   : > { %v1270_v29 = vadd.f32 %v1269_v8, %v1250_v4  ;;  %v1291_v7 = vadd.f32 %v1290_v3, %v1251_v10  ;;  %v1383_v3 = vld [vmem:[#allocation3] sm:$0x3] (!%p1617_p7)  ;;  %v3386_v4 = vld [vmem:[#allocation47_spill] sm:$0xff] (!%p1617_p7) }
 0x4f9   : > { %v1271_v45 = vadd.f32 %v1270_v29, %v1252_v61  ;;  %v1292_v39 = vadd.f32 %v1291_v7, %v1253_v12 }
 0x4fb   : > { %v1272_v33 = vadd.f32 %v1271_v45, %v1254_v22  ;;  %v1293_v46 = vadd.f32 %v1292_v39, %v1255_v20 }
 0x4fd   : > { %v1273_v38 = vadd.f32 %v1272_v33, %v1256_v6  ;;  %v1294_v2 = vadd.f32 %v1293_v46, %v1257_v5 }
 0x4ff   : > { %v1274_v56 = vadd.f32 %v1273_v38, %v1258_v27  ;;  %v1295_v57 = vadd.f32 %v1294_v2, %v1259_v35 }
 0x501   : > { %v1275_v26 = vrot.slane %v1274_v56, 4  ;;  %v1296_v55 = vrot.slane %v1295_v57, 4 }
 0x503   : > { %v1276_v1 = vadd.f32 %v1275_v26, %v1274_v56  ;;  %v1297_v41 = vadd.f32 %v1296_v55, %v1295_v57 }
 0x505   : > { %v1277_v19 = vrot.slane %v1276_v1, 2  ;;  %v1298_v30 = vrot.slane %v1297_v41, 2 }
 0x507   : > { %v1278_v53 = vadd.f32 %v1277_v19, %v1276_v1  ;;  %v1299_v63 = vadd.f32 %v1298_v30, %v1297_v41 }
 0x509   : > { %v1279_v36 = vrot.slane %v1278_v53, 1  ;;  %v1300_v40 = vrot.slane %v1299_v63, 1 }
 0x50b   : > { %v1280_v58 = vadd.f32 %v1279_v36, %v1278_v53  ;;  %v1301_v42 = vadd.f32 %v1300_v40, %v1299_v63 }
 0x50d   : > { %v1353_v50 = vsel %vm1314_vm7, %v1280_v58, %v1346_v16  ;;  %v1354_v23 = vsel %vm1315_vm8, %v1301_v42, %v1350_v0  ;;  %vm1396_vm7 = vcmask (!%p1617_p7), 1040384   ;;  %vm1438_vm8 = vcmask (!%p1617_p7), 0  }
 0x50e   : > { %v1357_v47 = vcombine.low %v1353_v50, %v1354_v23  ;;  %1377 = sbr.rel (%p1617_p7) target bundleno = 1606 (0x646), region = 48 }
 0x510   : > { %v1364_v44 = vrot.slane %v1357_v47, %v2811_v11 }
 0x512   : > { %v1371_v60 = vrot.slane %v1364_v44, %v2811_v11 }
 0x514   : > { %1373 = vst.msk [vmem:[#allocation4] sm:$0x3] %vm3021_vm15, %v1371_v60 }
 0x51b   : > { %v1378_v9 = vld [vmem:[#allocation4] sm:$0x3] }
 0x51c   : > { %v1379_v8 = vsub.f32 1.0, %v1378_v9 }
 0x51e   : > { %v1380_v18 = vmul.f32 2.0, %v1379_v8 }
 0x520   : > { %v1381_v31 = vmul.f32 1.442695, %v1380_v18 }
 0x522   : > { %1882 = vpow2.f32 %v1381_v31 }
 0x52c   : > { %v1883_v17 = vpop.eup %1882 }
 0x52d   : > { %v1384_v25 = vmul.f32 %v1883_v17, %v1383_v3  ;;  %1432 = vst.msk [vmem:[%s2357_s29] sm:$0x3] %vm3021_vm15, %v1883_v17  ;;  %v1413_v11 = vrot.slane %v1883_v17, %v3385_v54  ;;  %v1417_v14 = vrot.slane %v1883_v17, %v3386_v4 }
 0x52f   : > { %v1389_v10 = vrot.slane %v1384_v25, %v3385_v54  ;;  %v1393_v15 = vrot.slane %v1384_v25, %v3386_v4  ;;  %v1420_v48 = vsel %vm1396_vm7, %v1413_v11, 0.0  ;;  %v1421_v61 = vsel %vm1396_vm7, %v1417_v14, 0.0 }
 0x530   : > { %v1422_v12 = vadd.f32 %v1421_v61, %v1420_v48 }
 0x531   : > { %v1397_v29 = vsel %vm1396_vm7, %v1389_v10, 0.0  ;;  %v1398_v7 = vsel %vm1396_vm7, %v1393_v15, 0.0 }
 0x532   : > { %v1399_v62 = vadd.f32 %v1398_v7, %v1397_v29 }
 0x534   : > { %1400 = vadd.xlane.f32.xlu0 %v1399_v62 }
 0x538   : > { %1423 = vadd.xlane.f32.xlu0 %v1422_v12 }
 0x5c1   : > { %v1401_v28 = vpop.xlane.xlu0 %1400 }
 0x5c2   : > { %v1402_v21 = vrot.slane %v1401_v28, 4 }
 0x5c4   : > { %v1403_v45 = vadd.f32 %v1402_v21, %v1401_v28 }
 0x5c5   : > { %v1424_v39 = vpop.xlane.xlu0 %1423 }
 0x5c6   : > { %v1404_v52 = vrot.slane %v1403_v45, 2  ;;  %v1425_v22 = vrot.slane %v1424_v39, 4 }
 0x5c8   : > { %v1426_v34 = vadd.f32 %v1425_v22, %v1424_v39  ;;  %v1405_v20 = vadd.f32 %v1404_v52, %v1403_v45 }
 0x5ca   : > { %v1427_v13 = vrot.slane %v1426_v34, 2  ;;  %v1406_v33 = vrot.slane %v1405_v20, 1 }
 0x5cc   : > { %v1428_v46 = vadd.f32 %v1427_v13, %v1426_v34  ;;  %v1407_v24 = vadd.f32 %v1406_v33, %v1405_v20 }
 0x5ce   : > { %1627 = vpush %v1407_v24  ;;  %v1429_v6 = vrot.slane %v1428_v46, 1 }
 0x5d0   : > { %v1430_v51 = vadd.f32 %v1429_v6, %v1428_v46 }
 0x5d2   : > { %1629 = vpush %v1430_v51 }
 0x5ff   : > { %s1628_s5 = spop %1627 }
 0x603   : > { %s1630_s14 = spop %1629 }
 0x604   : > { %v1433_v5 = vstv %s1630_s14 }
 0x605   : > { %1884 = vrcp.f32 %v1433_v5 }
 0x60f   : > { %v1885_v38 = vpop.eup %1884 }
 0x610   : > { %1631 = vpush %v1885_v38 }
 0x641   : > { %s1632_s18 = spop %1631 }
 0x642   : > { %s1436_s3 = smul.f32 %s1632_s18, %s1628_s5 }
 0x644   : > { %v1437_v2 = vstv %s1436_s3 }
 0x645   : > { %1439 = vst.msk [vmem:[%s275_s13] sm:$0x1] %vm1438_vm8, %v1437_v2 }
 0x646 PF: > { %s1624_s28 = sshll.u32 %s2060_s22, 5  ;;  %s3387_s10 = sld [smem:[#allocation53_spill]] }
 0x647   : > { %s1458_s0 = sshll.u32 %s2357_s29, 4  ;;  %s1441_s5 = scalar_lea.sflag [#allocation7], %s2337_s9  ;;  %s1459_s0 = int_to_ptr.vmem [resolvable:$true] %s1458_s0 }
 0x648   : > { %s1946_s18 = scalar_lea.vmem %s1459_s0, 32  ;;  %p3388_p1 = scmp.ne.s32.totalorder %s3287_s26, 0 }
 0x649   : > { %p1947_p12 = scmp.ne.s32.totalorder %s1459_s0, %s1946_s18  ;;  %s2082_s7 = smov [#allocation10]  }
 0x64a   : > { %s1950_s13 = sshll.u32 %s2082_s7, 4  ;;  %s1951_s13 = int_to_ptr.vmem [resolvable:$false] %s1950_s13 }
 0x64b   : > { %p1948_p5 = pnand %p1947_p12, %p3388_p1  ;;  %s1952_s3 = scalar_lea.vmem %s1951_s13, 64 }
 0x64c   : > { %s3157_s14 = scalar_lea.hbm %s3387_s10, %s1624_s28  ;;  %p1953_p8 = scmp.lt.s32.totalorder %s1459_s0, %s1951_s13 }
 0x64d   : > { %p1949_p6 = pneg %p1948_p5  ;;  %p1954_p13 = scmp.lt.s32.totalorder %s1952_s3, %s1946_s18 }
 0x64f   : > { %p1955_p4 = por %p1954_p13, %p1953_p8 }
 0x651   : > { %p1956_p0 = pnand %p1955_p4, %p1949_p6 }
 0x653   : > { %1959 = shalt.err (!%p1956_p0)
}
 0x654   : > { %s1960_s22 = scalar_lea.hbm %s3157_s14, 32  ;;  %s1964_s30 = scalar_lea.hbm %s3387_s10, 64 }
 0x655   : > { %p1961_p3 = scmp.ne.s32.totalorder %s3157_s14, %s1960_s22  ;;  %p1965_p11 = scmp.lt.u32.totalorder %s3157_s14, %s3387_s10 }
 0x656   : > { %p1966_p10 = scmp.lt.u32.totalorder %s1964_s30, %s1960_s22  ;;  %p1968_p12 = scmp.lt.u32.totalorder %s1960_s22, %s3157_s14 }
 0x657   : > { %p1962_p2 = pnand %p1961_p3, %p3388_p1 }
 0x658   : > { %p1967_p7 = por %p1966_p10, %p1965_p11 }
 0x659   : > { %p1963_p9 = pneg %p1962_p2 }
 0x65a   : > { %p1969_p5 = por %p1968_p12, %p1967_p7 }
 0x65c   : > { %p1970_p6 = pnand %p1969_p5, %p1963_p9 }
 0x65e   : > { %1973 = shalt.err (!%p1970_p6)
}
 0x65f   : > { %1637 = dma.vmem_to_hbm [thread:$0]  (%p3388_p1), %s1459_s0, 32, %s3157_s14, %s1441_s5  }
 0x660 PF: > { %p1651_p8 = scmp.ge.s32.totalorder %s2072_s25, 2  ;;  %s1473_s6 = sand.u32 1, %s2032_s15  }
 0x661   : > { %p3389_p13 = scmp.ne.s32.totalorder %s3288_s8, 0  ;;  %s1474_s21 = scalar_lea.sflag [#allocation7], %s1473_s6 }
 0x663   : > { %p1647_p4 = pnand %p1651_p8, %p3389_p13 }
 0x665   : > { %2027 = dma.done.wait (!%p1647_p4), %s1474_s21, 32  }
 0x666   : > { %2029 = vsyncadd (!%p1647_p4), %s1474_s21, 4294967264  ;;  %s24_s25 = sadd.s32 1, %s2072_s25   ;;  %s3390_s0 = sld [smem:[#allocation15_spill]] }
 0x667   : > { %p21_p0 = scmp.ge.s32.totalorder %s24_s25, 6   ;;  %s3391_s26 = sld [smem:[#allocation16_spill]] }
 0x668   : > { %s3392_s15 = smov %s2036_s16  ;;  %s3393_s16 = smov %s2040_s17 }
 0x669   : > { %s3394_s17 = smov %s2262_s27  ;;  %s3395_s18 = smov %s2048_s19 }
 0x66a   : > { %s3396_s19 = smov %s2052_s20  ;;  %s3397_s20 = smov %s2203_s12 }
 0x66b   : > { %s3398_s21 = smov %s2064_s23  ;;  %s3399_s22 = smov %s2068_s24 }
 0x66c   : > { %s3400_s23 = smov %s3390_s0  ;;  %23 = sbr.rel (!%p21_p0) target bundleno = 14 (0xe), region = 110 }
 0x66d   : > { %s3401_s24 = smov %s3391_s26 }
 0x673   :  { %1485 = vsyncpa [#allocation6], 1 }
 0x674   :  { %1487 = vsyncpa [#allocation6 + $0x1], 1 }
 0x675   :  { %1488 = vsyncpa [#allocation9], 1 }
 0x676   :  { %1490 = vsyncpa [#allocation9 + $0x1], 1 }
 0x677   :  { %1491 = vsyncpa [#allocation7], 1 }
 0x678   :  { %1493 = vsyncpa [#allocation7 + $0x1], 1 }

</bundles_post_ra>
